<compile_context>
chip_gen: v6e
topology: v6e:2x2x1
jax: 0.10.0
libtpu: 0.0.40
codegen_flags: <defaults>
</compile_context>

<pallas_src>
import functools

import jax
import jax.numpy as jnp
from jax import lax
from jax.experimental import pallas as pl
from jax.experimental.pallas import tpu as pltpu


# -----------------------------------------------------------------------------
# Small helpers
# -----------------------------------------------------------------------------
def _round_up(x, m):
    return ((x + m - 1) // m) * m


def _pick_tile(m, target):
    """Largest exact divisor of m <= target (prefer multiples of 8); m if tiny."""
    if m <= target:
        return m
    for t in range(target, 7, -1):
        if m % t == 0 and t % 8 == 0:
            return t
    for t in range(target, 7, -1):
        if m % t == 0:
            return t
    return m


def _pick_gpb(groups, opg, d, lane_target=128):
    """Groups packed per matmul so the output stripe is lane-dense (>=128 or == D)."""
    # TODO(synk): try lane_target=256 on v6e/v7x (256-wide MXU); costs 2x weight VMEM.
    if d <= lane_target:
        return groups
    for gpb in range(1, groups + 1):
        if groups % gpb == 0 and (gpb * opg) % lane_target == 0:
            return gpb
    return groups


def _compiler_params(dims):
    """CompilerParams with an explicit VMEM budget (~3/4 of physical, capped)."""
    try:
        cap = int(pltpu.get_tpu_info().vmem_capacity_bytes)
    except Exception:
        cap = 128 * 1024 * 1024
    limit = min((cap * 3) // 4, 100 * 1024 * 1024)
    return pltpu.CompilerParams(dimension_semantics=dims, vmem_limit_bytes=limit)


def bn_fold(gamma, beta, mean, var, eps=1e-5):
    scale = gamma / jnp.sqrt(var + eps)
    shift = beta - mean * scale
    return scale, shift


# -----------------------------------------------------------------------------
# Kernel 1: matmul (bf16 -> f32 acc) + folded BN + optional ReLU
# Used for conv_reduce + bn_reduce + relu.  No scratch when K is resident.
# -----------------------------------------------------------------------------
def _mm_bn_act_kernel(x_ref, w_ref, sc_ref, sh_ref, o_ref, *, apply_relu):
    y = jnp.dot(x_ref[...], w_ref[...], preferred_element_type=jnp.float32)
    y = y * sc_ref[...] + sh_ref[...]
    if apply_relu:
        y = jnp.maximum(y, 0.0)
    o_ref[...] = y.astype(o_ref.dtype)


def _mm_bn_act_acc_kernel(x_ref, w_ref, sc_ref, sh_ref, o_ref, acc_ref, *,
                          apply_relu):
    @pl.when(pl.program_id(1) == 0)
    def _():
        acc_ref[...] = jnp.zeros_like(acc_ref)

    acc_ref[...] += jnp.dot(x_ref[...], w_ref[...],
                            preferred_element_type=jnp.float32)

    @pl.when(pl.program_id(1) == pl.num_programs(1) - 1)
    def _():
        y = acc_ref[...] * sc_ref[...] + sh_ref[...]
        if apply_relu:
            y = jnp.maximum(y, 0.0)
        o_ref[...] = y.astype(o_ref.dtype)


def matmul_bn_act(x2d, w2d, scale, shift, *, apply_relu, out_dtype=jnp.bfloat16,
                  tm=512, tk=2048):
    M0, K = x2d.shape
    Nout = w2d.shape[1]

    # Row tile: exact divisor in [256, tm] if one exists, else pad to tm.
    if M0 <= tm:
        tm_e = _round_up(M0, 8)
    else:
        tm_e = 0
        for t in range(tm, 255, -8):
            if M0 % t == 0:
                tm_e = t
                break
        if tm_e == 0:
            tm_e = tm
    Mp = _round_up(M0, tm_e)
    x = x2d if Mp == M0 else jnp.pad(x2d, ((0, Mp - M0), (0, 0)))

    sc = scale.reshape(1, -1).astype(jnp.float32)
    sh = shift.reshape(1, -1).astype(jnp.float32)

    kb = tk if (K > tk and K % tk == 0) else K
    nk = K // kb

    if nk == 1:
        out = pl.pallas_call(
            functools.partial(_mm_bn_act_kernel, apply_relu=apply_relu),
            out_shape=jax.ShapeDtypeStruct((Mp, Nout), out_dtype),
            grid=(Mp // tm_e,),
            in_specs=[
                pl.BlockSpec((tm_e, K), lambda i: (i, 0)),
                pl.BlockSpec((K, Nout), lambda i: (0, 0)),
                pl.BlockSpec((1, Nout), lambda i: (0, 0)),
                pl.BlockSpec((1, Nout), lambda i: (0, 0)),
            ],
            out_specs=pl.BlockSpec((tm_e, Nout), lambda i: (i, 0)),
            compiler_params=_compiler_params(("parallel",)),
        )(x, w2d, sc, sh)
    else:
        out = pl.pallas_call(
            functools.partial(_mm_bn_act_acc_kernel, apply_relu=apply_relu),
            out_shape=jax.ShapeDtypeStruct((Mp, Nout), out_dtype),
            grid=(Mp // tm_e, nk),
            in_specs=[
                pl.BlockSpec((tm_e, kb), lambda i, k: (i, k)),
                pl.BlockSpec((kb, Nout), lambda i, k: (k, 0)),
                pl.BlockSpec((1, Nout), lambda i, k: (0, 0)),
                pl.BlockSpec((1, Nout), lambda i, k: (0, 0)),
            ],
            out_specs=pl.BlockSpec((tm_e, Nout), lambda i, k: (i, 0)),
            scratch_shapes=[pltpu.VMEM((tm_e, Nout), jnp.float32)],
            compiler_params=_compiler_params(("parallel", "arbitrary")),
        )(x, w2d, sc, sh)
    return out if Mp == M0 else out[:M0]


# -----------------------------------------------------------------------------
# Kernel 2: grouped 3x3 conv + BN + ReLU, fused (no im2col).
# Input is the halo-padded, phase-split activation (N*stride^2, Hq, Wq, D);
# per (image, super-group) the kernel accumulates 9 tap matmuls against
# per-tap block-diagonal super-group weights and writes (1, Ho, Wo, csg_out).
# -----------------------------------------------------------------------------
def _grouped_conv3x3_kernel(y_ref, w_ref, sc_ref, sh_ref, o_ref, *, stride, ho, wo):
    s = stride
    csg_out = o_ref.shape[-1]
    phases = {}
    acc = None
    for ky in range(3):
        for kx in range(3):
            ph = (ky % s) * s + (kx % s)
            if ph not in phases:
                phases[ph] = y_ref[ph]                       # (Hq, Wq, csg_in)
            img = phases[ph]
            oh, ow = ky // s, kx // s
            win = img[oh:oh + ho, ow:ow + wo, :]             # static slice
            x2 = win.reshape(ho * wo, img.shape[-1])
            d = jnp.dot(x2, w_ref[0, 3 * ky + kx],
                        preferred_element_type=jnp.float32)
            acc = d if acc is None else acc + d
    y = jnp.maximum(acc * sc_ref[...] + sh_ref[...], 0.0)
    o_ref[0] = y.reshape(ho, wo, csg_out).astype(o_ref.dtype)


def grouped_conv3x3_bn_relu(y4, w_taps, scale, shift, *, stride,
                            out_dtype=jnp.bfloat16):
    N, H, W, D = y4.shape
    nsg, T, csg_in, csg_out = w_taps.shape
    s = stride
    Ho = (H - 1) // s + 1
    Wo = (W - 1) // s + 1
    Hq, Wq = Ho + 2, Wo + 2
    Hp, Wp = s * Hq, s * Wq

    # Halo pad (top/left = 1, bottom/right = whatever makes the phase split exact;
    # the extra zeros are never read by valid taps).
    yp = jnp.pad(y4, ((0, 0), (1, Hp - 1 - H), (1, Wp - 1 - W), (0, 0)))
    # Phase split for stride handling: (N, Hq, s, Wq, s, D) -> (N*s*s, Hq, Wq, D).
    # For stride == 1 this is a free reshape.
    yph = yp.reshape(N, Hq, s, Wq, s, D)
    yph = jnp.transpose(yph, (0, 2, 4, 1, 3, 5)).reshape(N * s * s, Hq, Wq, D)

    kern = functools.partial(_grouped_conv3x3_kernel, stride=s, ho=Ho, wo=Wo)
    return pl.pallas_call(
        kern,
        out_shape=jax.ShapeDtypeStruct((N, Ho, Wo, D), out_dtype),
        grid=(N, nsg),
        in_specs=[
            pl.BlockSpec((s * s, Hq, Wq, csg_in), lambda n, g: (n, 0, 0, g)),
            pl.BlockSpec((1, T, csg_in, csg_out), lambda n, g: (g, 0, 0, 0)),
            pl.BlockSpec((1, csg_out), lambda n, g: (0, g)),
            pl.BlockSpec((1, csg_out), lambda n, g: (0, g)),
        ],
        out_specs=pl.BlockSpec((1, Ho, Wo, csg_out), lambda n, g: (n, 0, 0, g)),
        compiler_params=_compiler_params(("parallel", "parallel")),
    )(yph, w_taps,
      scale.reshape(1, -1).astype(jnp.float32),
      shift.reshape(1, -1).astype(jnp.float32))


# -----------------------------------------------------------------------------
# Kernel 3: conv_expand (1x1) + bn_expand + fused global-avg-pool partial sums.
# S axis is "arbitrary" so the pooled accumulator stays VMEM-resident per n.
# TODO(synk): for v7x megacore at tiny N, split S into (outer parallel, inner
#             arbitrary) chunks with per-chunk partial sums reduced in se_gate.
# -----------------------------------------------------------------------------
def _expand_bn_pool_kernel(h_ref, w_ref, sc_ref, sh_ref, u_ref, ps_ref, pacc_ref):
    s = pl.program_id(1)

    @pl.when(s == 0)
    def _():
        pacc_ref[...] = jnp.zeros_like(pacc_ref)

    y = jnp.dot(h_ref[0], w_ref[...], preferred_element_type=jnp.float32)
    y = y * sc_ref[...] + sh_ref[...]
    u_ref[0] = y.astype(u_ref.dtype)
    pacc_ref[...] += jnp.sum(y, axis=0, keepdims=True)

    @pl.when(s == pl.num_programs(1) - 1)
    def _():
        ps_ref[0] = pacc_ref[...]


def expand_bn_pool(h3, w_exp, scale, shift, *, ts=512, out_dtype=jnp.bfloat16):
    N, S, D = h3.shape
    Cout = w_exp.shape[1]
    ts = _pick_tile(S, ts)
    return pl.pallas_call(
        _expand_bn_pool_kernel,
        out_shape=(jax.ShapeDtypeStruct((N, S, Cout), out_dtype),
                   jax.ShapeDtypeStruct((N, 1, Cout), jnp.float32)),
        grid=(N, S // ts),
        in_specs=[
            pl.BlockSpec((1, ts, D), lambda n, s: (n, s, 0)),
            pl.BlockSpec((D, Cout), lambda n, s: (0, 0)),
            pl.BlockSpec((1, Cout), lambda n, s: (0, 0)),
            pl.BlockSpec((1, Cout), lambda n, s: (0, 0)),
        ],
        out_specs=(pl.BlockSpec((1, ts, Cout), lambda n, s: (n, s, 0)),
                   pl.BlockSpec((1, 1, Cout), lambda n, s: (n, 0, 0))),
        scratch_shapes=[pltpu.VMEM((1, Cout), jnp.float32)],
        compiler_params=_compiler_params(("parallel", "arbitrary")),
    )(h3, w_exp,
      scale.reshape(1, -1).astype(jnp.float32),
      shift.reshape(1, -1).astype(jnp.float32))


# -----------------------------------------------------------------------------
# Kernel 4: SE gate FCs  gate = sigmoid(relu(pool @ W1 + b1) @ W2 + b2)
# -----------------------------------------------------------------------------
def _se_gate_kernel(ps_ref, w1_ref, b1_ref, w2_ref, b2_ref, o_ref, *, inv_s):
    pooled = ps_ref[...] * inv_s
    h = jnp.dot(pooled, w1_ref[...], preferred_element_type=jnp.float32) + b1_ref[...]
    h = jnp.maximum(h, 0.0)
    z = jnp.dot(h, w2_ref[...], preferred_element_type=jnp.float32) + b2_ref[...]
    o_ref[...] = jax.nn.sigmoid(z)


def se_gate(psum, w1, b1, w2, b2, *, inv_s):
    N, Cout = psum.shape
    return pl.pallas_call(
        functools.partial(_se_gate_kernel, inv_s=inv_s),
        out_shape=jax.ShapeDtypeStruct((N, Cout), jnp.float32),
    )(psum, w1, b1, w2, b2)


# -----------------------------------------------------------------------------
# Kernel 5: SE scaling + shortcut (optional 1x1 conv + BN) + residual + ReLU
# bf16 output (next block consumes bf16; halves the write traffic).
# -----------------------------------------------------------------------------
def _gate_res_proj_kernel(u_ref, xs_ref, w_ref, sc_ref, sh_ref, g_ref, o_ref):
    res = jnp.dot(xs_ref[0], w_ref[...], preferred_element_type=jnp.float32)
    res = res * sc_ref[...] + sh_ref[...]
    y = u_ref[0].astype(jnp.float32) * g_ref[0] + res
    o_ref[0] = jnp.maximum(y, 0.0).astype(o_ref.dtype)


def gate_residual_proj(u, xs, w_short, scale, shift, gate, *, ts=512,
                       out_dtype=jnp.bfloat16):
    N, S, Cout = u.shape
    Cin = xs.shape[2]
    ts = _pick_tile(S, ts)
    return pl.pallas_call(
        _gate_res_proj_kernel,
        out_shape=jax.ShapeDtypeStruct((N, S, Cout), out_dtype),
        grid=(N, S // ts),
        in_specs=[
            pl.BlockSpec((1, ts, Cout), lambda n, s: (n, s, 0)),
            pl.BlockSpec((1, ts, Cin), lambda n, s: (n, s, 0)),
            pl.BlockSpec((Cin, Cout), lambda n, s: (0, 0)),
            pl.BlockSpec((1, Cout), lambda n, s: (0, 0)),
            pl.BlockSpec((1, Cout), lambda n, s: (0, 0)),
            pl.BlockSpec((1, 1, Cout), lambda n, s: (n, 0, 0)),
        ],
        out_specs=pl.BlockSpec((1, ts, Cout), lambda n, s: (n, s, 0)),
        compiler_params=_compiler_params(("parallel", "parallel")),
    )(u, xs, w_short,
      scale.reshape(1, -1).astype(jnp.float32),
      shift.reshape(1, -1).astype(jnp.float32), gate)


def _gate_res_id_kernel(u_ref, xs_ref, g_ref, o_ref):
    y = u_ref[0].astype(jnp.float32) * g_ref[0] + xs_ref[0].astype(jnp.float32)
    o_ref[0] = jnp.maximum(y, 0.0).astype(o_ref.dtype)


def gate_residual_identity(u, xs, gate, *, ts=512, out_dtype=jnp.bfloat16):
    N, S, Cout = u.shape
    ts = _pick_tile(S, ts)
    return pl.pallas_call(
        _gate_res_id_kernel,
        out_shape=jax.ShapeDtypeStruct((N, S, Cout), out_dtype),
        grid=(N, S // ts),
        in_specs=[
            pl.BlockSpec((1, ts, Cout), lambda n, s: (n, s, 0)),
            pl.BlockSpec((1, ts, Cout), lambda n, s: (n, s, 0)),
            pl.BlockSpec((1, 1, Cout), lambda n, s: (n, 0, 0)),
        ],
        out_specs=pl.BlockSpec((1, ts, Cout), lambda n, s: (n, s, 0)),
        compiler_params=_compiler_params(("parallel", "parallel")),
    )(u, xs, gate)


# -----------------------------------------------------------------------------
# Grouped-conv weight packing: per-tap block-diagonal super-group blocks.
# -----------------------------------------------------------------------------
def grouped_weight_taps(w_pt, groups):
    # w_pt: PyTorch grouped-conv layout (D, D/groups, 3, 3) -> (9, G, cpg, opg)
    d_out, cpg, kh, kw = w_pt.shape
    opg = d_out // groups
    w = w_pt.reshape(groups, opg, cpg, kh * kw)              # (G, opg, cpg, 9)
    return jnp.transpose(w, (3, 0, 2, 1))                    # (9, G, cpg, opg)


def supergroup_tap_weight(wt, gpb):
    # (9, G, cpg, opg) -> (nsg, 9, gpb*cpg, gpb*opg), block-diagonal per tap.
    T, G, cpg, opg = wt.shape
    nsg = G // gpb
    w = wt.reshape(T, nsg, gpb, cpg, opg)
    eye = jnp.eye(gpb, dtype=wt.dtype)
    wbd = jnp.einsum("tsjco,jl->tsjclo", w, eye)             # (9, nsg, gpb, cpg, gpb, opg)
    wbd = wbd.reshape(T, nsg, gpb * cpg, gpb * opg)
    return jnp.transpose(wbd, (1, 0, 2, 3))                  # (nsg, 9, gpb*cpg, gpb*opg)


# -----------------------------------------------------------------------------
# Bottleneck forward (Pallas)
# -----------------------------------------------------------------------------
def bottleneck_forward(x_nchw, p, *, stride, cardinality):
    xb = jnp.transpose(x_nchw, (0, 2, 3, 1)).astype(jnp.bfloat16)   # NHWC bf16
    N, H, W, Cin = xb.shape
    D = p["w_reduce"].shape[1]
    Cout = p["w_expand"].shape[1]

    # 1) conv_reduce (1x1) + bn_reduce + relu
    sc, sh = bn_fold(*p["bn_reduce"])
    y = matmul_bn_act(xb.reshape(N * H * W, Cin),
                      p["w_reduce"].astype(jnp.bfloat16), sc, sh, apply_relu=True)
    y = y.reshape(N, H, W, D)

    # 2) grouped 3x3 conv + bn + relu (fused tap accumulation; no im2col blowup)
    sc, sh = bn_fold(*p["bn"])
    h = grouped_conv3x3_bn_relu(y, p["w_conv_taps"].astype(jnp.bfloat16), sc, sh,
                                stride=stride)
    _, Ho, Wo, _ = h.shape
    S = Ho * Wo

    # 3) conv_expand (1x1) + bn_expand + global-average-pool partial sums (fused)
    sc, sh = bn_fold(*p["bn_expand"])
    u, psum = expand_bn_pool(h.reshape(N, S, D),
                             p["w_expand"].astype(jnp.bfloat16), sc, sh)

    # 4) SE gate FCs
    gate = se_gate(psum.reshape(N, Cout), p["w_fc1"], p["b_fc1"].reshape(1, -1),
                   p["w_fc2"], p["b_fc2"].reshape(1, -1), inv_s=1.0 / S)

    # 5) SE scaling + shortcut conv/bn (fused) + residual add + relu (bf16 out)
    if stride == 1:
        xs = xb.reshape(N, S, Cin)
    else:
        # TODO(synk): fold the stride subsample into kernel-5's BlockSpec index_map
        #             instead of materializing it through XLA.
        xs = xb[:, ::stride, ::stride, :].reshape(N, S, Cin)
    if Cin != Cout:
        sc, sh = bn_fold(*p["bn_short"])
        out = gate_residual_proj(u, xs, p["w_short"].astype(jnp.bfloat16),
                                 sc, sh, gate.reshape(N, 1, Cout))
    else:
        out = gate_residual_identity(u, xs, gate.reshape(N, 1, Cout))

    out = out.reshape(N, Ho, Wo, Cout)
    # NOTE: a following block would ideally consume NHWC bf16 directly; the NCHW
    # transpose is kept only to preserve the PyTorch module's output contract.
    return jnp.transpose(out, (0, 3, 1, 2))


# -----------------------------------------------------------------------------
# Pure-JAX f32 reference (same math, XLA ops) for verification
# -----------------------------------------------------------------------------
def bottleneck_reference(x_nchw, p, raw, *, stride, cardinality):
    x = jnp.transpose(x_nchw, (0, 2, 3, 1)).astype(jnp.float32)
    Cin = x.shape[-1]
    Cout = p["w_expand"].shape[1]

    def bn(y, params):
        sc, sh = bn_fold(*params)
        return y * sc + sh

    out = jnp.einsum("nhwc,cd->nhwd", x, p["w_reduce"])
    out = jax.nn.relu(bn(out, p["bn_reduce"]))
    w_hwio = jnp.transpose(raw["w_conv_pt"], (2, 3, 1, 0))
    out = lax.conv_general_dilated(out, w_hwio, (stride, stride), ((1, 1), (1, 1)),
                                   dimension_numbers=("NHWC", "HWIO", "NHWC"),
                                   feature_group_count=cardinality)
    out = jax.nn.relu(bn(out, p["bn"]))
    out = jnp.einsum("nhwd,dc->nhwc", out, p["w_expand"])
    out = bn(out, p["bn_expand"])
    if Cin != Cout:
        res = jnp.einsum("nhwc,cd->nhwd", x[:, ::stride, ::stride, :], p["w_short"])
        res = bn(res, p["bn_short"])
    else:
        res = x[:, ::stride, ::stride, :]
    pooled = out.mean(axis=(1, 2))
    hh = jax.nn.relu(pooled @ p["w_fc1"] + p["b_fc1"])
    gate = jax.nn.sigmoid(hh @ p["w_fc2"] + p["b_fc2"])
    y = jax.nn.relu(out * gate[:, None, None, :] + res)
    return jnp.transpose(y, (0, 3, 1, 2))


# -----------------------------------------------------------------------------
# Deterministic parameter construction
# -----------------------------------------------------------------------------
def make_params(key, in_channels, out_channels, stride, cardinality, base_width,
                expansion):
    width_ratio = out_channels / (expansion * 64.0)
    D = cardinality * int(base_width * width_ratio)
    cr = out_channels // 16  # SE reduction

    ks = jax.random.split(key, 16)

    def bn_params(k, c):
        k1, k2, k3, k4 = jax.random.split(k, 4)
        gamma = 1.0 + 0.1 * jax.random.normal(k1, (c,), jnp.float32)
        beta = 0.1 * jax.random.normal(k2, (c,), jnp.float32)
        mean = 0.1 * jax.random.normal(k3, (c,), jnp.float32)
        var = jax.random.uniform(k4, (c,), jnp.float32, 0.5, 1.5)
        return (gamma, beta, mean, var)

    # PyTorch-layout conv weights
    w_reduce_pt = 0.1 * jax.random.normal(ks[0], (D, in_channels), jnp.float32)
    w_conv_pt = 0.1 * jax.random.normal(ks[1], (D, D // cardinality, 3, 3), jnp.float32)
    w_expand_pt = 0.1 * jax.random.normal(ks[2], (out_channels, D), jnp.float32)
    w_short_pt = 0.1 * jax.random.normal(ks[3], (out_channels, in_channels), jnp.float32)
    w_fc1_pt = 0.1 * jax.random.normal(ks[4], (cr, out_channels), jnp.float32)
    b_fc1 = 0.1 * jax.random.normal(ks[5], (cr,), jnp.float32)
    w_fc2_pt = 0.1 * jax.random.normal(ks[6], (out_channels, cr), jnp.float32)
    b_fc2 = 0.1 * jax.random.normal(ks[7], (out_channels,), jnp.float32)

    opg = D // cardinality
    gpb = _pick_gpb(cardinality, opg, D)
    wt = grouped_weight_taps(w_conv_pt, cardinality)          # (9, G, cpg, opg)
    w_conv_taps = supergroup_tap_weight(wt, gpb)              # (nsg, 9, gpb*cpg, gpb*opg)

    params = {
        "w_reduce": w_reduce_pt.T,                            # (Cin, D)
        "w_conv_taps": w_conv_taps,
        "w_expand": w_expand_pt.T,                            # (D, Cout)
        "w_short": w_short_pt.T,                              # (Cin, Cout)
        "w_fc1": w_fc1_pt.T, "b_fc1": b_fc1,                  # (Cout, Cr)
        "w_fc2": w_fc2_pt.T, "b_fc2": b_fc2,                  # (Cr, Cout)
        "bn_reduce": bn_params(ks[8], D),
        "bn": bn_params(ks[9], D),
        "bn_expand": bn_params(ks[10], out_channels),
        "bn_short": bn_params(ks[11], out_channels),
    }
    raw = {"w_conv_pt": w_conv_pt}
    return params, raw, D


if __name__ == "__main__":
    # Small config: in=32, out=64, stride=1, cardinality=8, base_width=16,
    # expansion=4 -> D=32 (cpg=opg=4), SE reduction -> Cr=4.
    N, Cin, Cout, H, W = 2, 32, 64, 8, 8
    stride, cardinality, base_width, expansion = 1, 8, 16, 4

    key = jax.random.PRNGKey(0)
    kx, kp = jax.random.split(key)
    x = jax.random.normal(kx, (N, Cin, H, W), jnp.float32)   # NCHW like PyTorch

    params, raw, D = make_params(kp, Cin, Cout, stride, cardinality, base_width,
                                 expansion)

    fwd = jax.jit(functools.partial(bottleneck_forward, stride=stride,
                                    cardinality=cardinality))
    y = jax.block_until_ready(fwd(x, params))

    y_ref = bottleneck_reference(x, params, raw, stride=stride,
                                 cardinality=cardinality)
    assert y.shape == (N, Cout, H // stride, W // stride)
    y32 = jnp.asarray(y, jnp.float32)
    max_err = float(jnp.max(jnp.abs(y32 - y_ref)))
    # bf16 MXU operands / bf16 intermediates / bf16 output vs. f32 reference.
    assert jnp.allclose(y32, y_ref, atol=1e-1, rtol=1e-1), max_err

    print("KERNEL_OK")
</pallas_src>

<mosaic_0001>
module attributes {stable_mosaic.version = 11 : i64} {
  func.func @_mm_bn_act_kernel(%arg0: i32, %arg1: memref<128x32xbf16, #tpu.memory_space<vmem>>, %arg2: memref<32x32xbf16, #tpu.memory_space<vmem>>, %arg3: memref<1x32xf32, #tpu.memory_space<vmem>>, %arg4: memref<1x32xf32, #tpu.memory_space<vmem>>, %arg5: memref<128x32xbf16, #tpu.memory_space<vmem>>) attributes {dimension_semantics = [#tpu.dimension_semantics<parallel>], iteration_bounds = array<i64: 1>, scalar_prefetch = 0 : i64, scratch_operands = 0 : i64, tpu.core_type = #tpu.core_type<tc>, window_params = [{transform_indices = @transform_0, window_bounds = array<i64: 128, 32>}, {pipeline_mode = #tpu.pipeline_mode<synchronous>, transform_indices = @transform_1, window_bounds = array<i64: 32, 32>}, {pipeline_mode = #tpu.pipeline_mode<synchronous>, transform_indices = @transform_2, window_bounds = array<i64: 1, 32>}, {pipeline_mode = #tpu.pipeline_mode<synchronous>, transform_indices = @transform_3, window_bounds = array<i64: 1, 32>}, {transform_indices = @transform_4, window_bounds = array<i64: 128, 32>}]} {
    %c0 = arith.constant 0 : index
    %c0_0 = arith.constant 0 : index
    %0 = vector.load %arg1[%c0, %c0_0] : memref<128x32xbf16, #tpu.memory_space<vmem>>, vector<128x32xbf16>
    %c0_1 = arith.constant 0 : index
    %c0_2 = arith.constant 0 : index
    %1 = vector.load %arg2[%c0_1, %c0_2] : memref<32x32xbf16, #tpu.memory_space<vmem>>, vector<32x32xbf16>
    %cst = arith.constant dense<0.000000e+00> : vector<128x32xf32>
    %2 = tpu.matmul %0, %1, %cst {dimension_numbers = #tpu.dot_dimension_numbers<[1], [0], [0], [1], [0, 0, 1, 1], [], []>} : vector<128x32xbf16>, vector<32x32xbf16>, vector<128x32xf32> -> vector<128x32xf32>
    %c0_3 = arith.constant 0 : index
    %c0_4 = arith.constant 0 : index
    %3 = vector.load %arg3[%c0_3, %c0_4] : memref<1x32xf32, #tpu.memory_space<vmem>>, vector<1x32xf32>
    %4 = vector.broadcast %3 : vector<1x32xf32> to vector<128x32xf32>
    %5 = arith.mulf %2, %4 : vector<128x32xf32>
    %c0_5 = arith.constant 0 : index
    %c0_6 = arith.constant 0 : index
    %6 = vector.load %arg4[%c0_5, %c0_6] : memref<1x32xf32, #tpu.memory_space<vmem>>, vector<1x32xf32>
    %7 = vector.broadcast %6 : vector<1x32xf32> to vector<128x32xf32>
    %8 = arith.addf %5, %7 : vector<128x32xf32>
    %cst_7 = arith.constant 0.000000e+00 : f32
    %9 = vector.broadcast %cst_7 : f32 to vector<128x32xf32>
    %10 = arith.maximumf %8, %9 : vector<128x32xf32>
    %11 = arith.truncf %10 : vector<128x32xf32> to vector<128x32xbf16>
    %c0_8 = arith.constant 0 : index
    %c0_9 = arith.constant 0 : index
    %12 = vector.load %arg5[%c0_8, %c0_9] : memref<128x32xbf16, #tpu.memory_space<vmem>>, vector<128x32xbf16>
    tpu.vector_store %arg5[%c0_8, %c0_9], %11 {strides = array<i32>} : memref<128x32xbf16, #tpu.memory_space<vmem>>, vector<128x32xbf16>,
    return
  }
  func.func @transform_0(%arg0: i32) -> (i32, i32) {
    %c0_i32 = arith.constant 0 : i32
    %c0_i32_0 = arith.constant 0 : i32
    return %arg0, %c0_i32 : i32, i32
  }
  func.func @transform_1(%arg0: i32) -> (i32, i32) {
    %c0_i32 = arith.constant 0 : i32
    %c0_i32_0 = arith.constant 0 : i32
    %c0_i32_1 = arith.constant 0 : i32
    return %c0_i32, %c0_i32_0 : i32, i32
  }
  func.func @transform_2(%arg0: i32) -> (i32, i32) {
    %c0_i32 = arith.constant 0 : i32
    %c0_i32_0 = arith.constant 0 : i32
    %c0_i32_1 = arith.constant 0 : i32
    return %c0_i32, %c0_i32_0 : i32, i32
  }
  func.func @transform_3(%arg0: i32) -> (i32, i32) {
    %c0_i32 = arith.constant 0 : i32
    %c0_i32_0 = arith.constant 0 : i32
    %c0_i32_1 = arith.constant 0 : i32
    return %c0_i32, %c0_i32_0 : i32, i32
  }
  func.func @transform_4(%arg0: i32) -> (i32, i32) {
    %c0_i32 = arith.constant 0 : i32
    %c0_i32_0 = arith.constant 0 : i32
    return %arg0, %c0_i32 : i32, i32
  }
}

module attributes {stable_mosaic.version = 11 : i64} {
  func.func @_grouped_conv3x3_kernel(%arg0: i32, %arg1: i32, %arg2: memref<1x10x10x32xbf16, #tpu.memory_space<vmem>>, %arg3: memref<1x9x32x32xbf16, #tpu.memory_space<vmem>>, %arg4: memref<1x32xf32, #tpu.memory_space<vmem>>, %arg5: memref<1x32xf32, #tpu.memory_space<vmem>>, %arg6: memref<1x8x8x32xbf16, #tpu.memory_space<vmem>>) attributes {dimension_semantics = [#tpu.dimension_semantics<parallel>, #tpu.dimension_semantics<parallel>], iteration_bounds = array<i64: 2, 1>, scalar_prefetch = 0 : i64, scratch_operands = 0 : i64, tpu.core_type = #tpu.core_type<tc>, window_params = [{transform_indices = @transform_0, window_bounds = array<i64: 1, 10, 10, 32>}, {transform_indices = @transform_1, window_bounds = array<i64: 1, 9, 32, 32>}, {transform_indices = @transform_2, window_bounds = array<i64: 1, 32>}, {transform_indices = @transform_3, window_bounds = array<i64: 1, 32>}, {transform_indices = @transform_4, window_bounds = array<i64: 1, 8, 8, 32>}]} {
    %c0 = arith.constant 0 : index
    %c0_0 = arith.constant 0 : index
    %c0_1 = arith.constant 0 : index
    %c0_2 = arith.constant 0 : index
    %0 = vector.load %arg2[%c0, %c0_0, %c0_1, %c0_2] : memref<1x10x10x32xbf16, #tpu.memory_space<vmem>>, vector<1x10x10x32xbf16>
    %1 = vector.shape_cast %0 : vector<1x10x10x32xbf16> to vector<10x10x32xbf16>
    %2 = vector.extract_strided_slice %1 {offsets = [0, 0, 0], sizes = [8, 8, 32], strides = [1, 1, 1]} : vector<10x10x32xbf16> to vector<8x8x32xbf16>
    %3 = vector.shape_cast %2 : vector<8x8x32xbf16> to vector<64x32xbf16>
    %c0_3 = arith.constant 0 : index
    %c0_4 = arith.constant 0 : index
    %c0_5 = arith.constant 0 : index
    %c0_6 = arith.constant 0 : index
    %4 = vector.load %arg3[%c0_3, %c0_4, %c0_5, %c0_6] : memref<1x9x32x32xbf16, #tpu.memory_space<vmem>>, vector<1x1x32x32xbf16>
    %5 = vector.shape_cast %4 : vector<1x1x32x32xbf16> to vector<32x32xbf16>
    %cst = arith.constant dense<0.000000e+00> : vector<64x32xf32>
    %6 = tpu.matmul %3, %5, %cst {dimension_numbers = #tpu.dot_dimension_numbers<[1], [0], [0], [1], [0, 0, 1, 1], [], []>} : vector<64x32xbf16>, vector<32x32xbf16>, vector<64x32xf32> -> vector<64x32xf32>
    %7 = vector.extract_strided_slice %1 {offsets = [0, 1, 0], sizes = [8, 8, 32], strides = [1, 1, 1]} : vector<10x10x32xbf16> to vector<8x8x32xbf16>
    %8 = vector.shape_cast %7 : vector<8x8x32xbf16> to vector<64x32xbf16>
    %c0_7 = arith.constant 0 : index
    %c1 = arith.constant 1 : index
    %c0_8 = arith.constant 0 : index
    %c0_9 = arith.constant 0 : index
    %9 = vector.load %arg3[%c0_7, %c1, %c0_8, %c0_9] : memref<1x9x32x32xbf16, #tpu.memory_space<vmem>>, vector<1x1x32x32xbf16>
    %10 = vector.shape_cast %9 : vector<1x1x32x32xbf16> to vector<32x32xbf16>
    %cst_10 = arith.constant dense<0.000000e+00> : vector<64x32xf32>
    %11 = tpu.matmul %8, %10, %cst_10 {dimension_numbers = #tpu.dot_dimension_numbers<[1], [0], [0], [1], [0, 0, 1, 1], [], []>} : vector<64x32xbf16>, vector<32x32xbf16>, vector<64x32xf32> -> vector<64x32xf32>
    %12 = arith.addf %6, %11 : vector<64x32xf32>
    %13 = vector.extract_strided_slice %1 {offsets = [0, 2, 0], sizes = [8, 8, 32], strides = [1, 1, 1]} : vector<10x10x32xbf16> to vector<8x8x32xbf16>
    %14 = vector.shape_cast %13 : vector<8x8x32xbf16> to vector<64x32xbf16>
    %c0_11 = arith.constant 0 : index
    %c2 = arith.constant 2 : index
    %c0_12 = arith.constant 0 : index
    %c0_13 = arith.constant 0 : index
    %15 = vector.load %arg3[%c0_11, %c2, %c0_12, %c0_13] : memref<1x9x32x32xbf16, #tpu.memory_space<vmem>>, vector<1x1x32x32xbf16>
    %16 = vector.shape_cast %15 : vector<1x1x32x32xbf16> to vector<32x32xbf16>
    %cst_14 = arith.constant dense<0.000000e+00> : vector<64x32xf32>
    %17 = tpu.matmul %14, %16, %cst_14 {dimension_numbers = #tpu.dot_dimension_numbers<[1], [0], [0], [1], [0, 0, 1, 1], [], []>} : vector<64x32xbf16>, vector<32x32xbf16>, vector<64x32xf32> -> vector<64x32xf32>
    %18 = arith.addf %12, %17 : vector<64x32xf32>
    %19 = vector.extract_strided_slice %1 {offsets = [1, 0, 0], sizes = [8, 8, 32], strides = [1, 1, 1]} : vector<10x10x32xbf16> to vector<8x8x32xbf16>
    %20 = vector.shape_cast %19 : vector<8x8x32xbf16> to vector<64x32xbf16>
    %c0_15 = arith.constant 0 : index
    %c3 = arith.constant 3 : index
    %c0_16 = arith.constant 0 : index
    %c0_17 = arith.constant 0 : index
    %21 = vector.load %arg3[%c0_15, %c3, %c0_16, %c0_17] : memref<1x9x32x32xbf16, #tpu.memory_space<vmem>>, vector<1x1x32x32xbf16>
    %22 = vector.shape_cast %21 : vector<1x1x32x32xbf16> to vector<32x32xbf16>
    %cst_18 = arith.constant dense<0.000000e+00> : vector<64x32xf32>
    %23 = tpu.matmul %20, %22, %cst_18 {dimension_numbers = #tpu.dot_dimension_numbers<[1], [0], [0], [1], [0, 0, 1, 1], [], []>} : vector<64x32xbf16>, vector<32x32xbf16>, vector<64x32xf32> -> vector<64x32xf32>
    %24 = arith.addf %18, %23 : vector<64x32xf32>
    %25 = vector.extract_strided_slice %1 {offsets = [1, 1, 0], sizes = [8, 8, 32], strides = [1, 1, 1]} : vector<10x10x32xbf16> to vector<8x8x32xbf16>
    %26 = vector.shape_cast %25 : vector<8x8x32xbf16> to vector<64x32xbf16>
    %c0_19 = arith.constant 0 : index
    %c4 = arith.constant 4 : index
    %c0_20 = arith.constant 0 : index
    %c0_21 = arith.constant 0 : index
    %27 = vector.load %arg3[%c0_19, %c4, %c0_20, %c0_21] : memref<1x9x32x32xbf16, #tpu.memory_space<vmem>>, vector<1x1x32x32xbf16>
    %28 = vector.shape_cast %27 : vector<1x1x32x32xbf16> to vector<32x32xbf16>
    %cst_22 = arith.constant dense<0.000000e+00> : vector<64x32xf32>
    %29 = tpu.matmul %26, %28, %cst_22 {dimension_numbers = #tpu.dot_dimension_numbers<[1], [0], [0], [1], [0, 0, 1, 1], [], []>} : vector<64x32xbf16>, vector<32x32xbf16>, vector<64x32xf32> -> vector<64x32xf32>
    %30 = arith.addf %24, %29 : vector<64x32xf32>
    %31 = vector.extract_strided_slice %1 {offsets = [1, 2, 0], sizes = [8, 8, 32], strides = [1, 1, 1]} : vector<10x10x32xbf16> to vector<8x8x32xbf16>
    %32 = vector.shape_cast %31 : vector<8x8x32xbf16> to vector<64x32xbf16>
    %c0_23 = arith.constant 0 : index
    %c5 = arith.constant 5 : index
    %c0_24 = arith.constant 0 : index
    %c0_25 = arith.constant 0 : index
    %33 = vector.load %arg3[%c0_23, %c5, %c0_24, %c0_25] : memref<1x9x32x32xbf16, #tpu.memory_space<vmem>>, vector<1x1x32x32xbf16>
    %34 = vector.shape_cast %33 : vector<1x1x32x32xbf16> to vector<32x32xbf16>
    %cst_26 = arith.constant dense<0.000000e+00> : vector<64x32xf32>
    %35 = tpu.matmul %32, %34, %cst_26 {dimension_numbers = #tpu.dot_dimension_numbers<[1], [0], [0], [1], [0, 0, 1, 1], [], []>} : vector<64x32xbf16>, vector<32x32xbf16>, vector<64x32xf32> -> vector<64x32xf32>
    %36 = arith.addf %30, %35 : vector<64x32xf32>
    %37 = vector.extract_strided_slice %1 {offsets = [2, 0, 0], sizes = [8, 8, 32], strides = [1, 1, 1]} : vector<10x10x32xbf16> to vector<8x8x32xbf16>
    %38 = vector.shape_cast %37 : vector<8x8x32xbf16> to vector<64x32xbf16>
    %c0_27 = arith.constant 0 : index
    %c6 = arith.constant 6 : index
    %c0_28 = arith.constant 0 : index
    %c0_29 = arith.constant 0 : index
    %39 = vector.load %arg3[%c0_27, %c6, %c0_28, %c0_29] : memref<1x9x32x32xbf16, #tpu.memory_space<vmem>>, vector<1x1x32x32xbf16>
    %40 = vector.shape_cast %39 : vector<1x1x32x32xbf16> to vector<32x32xbf16>
    %cst_30 = arith.constant dense<0.000000e+00> : vector<64x32xf32>
    %41 = tpu.matmul %38, %40, %cst_30 {dimension_numbers = #tpu.dot_dimension_numbers<[1], [0], [0], [1], [0, 0, 1, 1], [], []>} : vector<64x32xbf16>, vector<32x32xbf16>, vector<64x32xf32> -> vector<64x32xf32>
    %42 = arith.addf %36, %41 : vector<64x32xf32>
    %43 = vector.extract_strided_slice %1 {offsets = [2, 1, 0], sizes = [8, 8, 32], strides = [1, 1, 1]} : vector<10x10x32xbf16> to vector<8x8x32xbf16>
    %44 = vector.shape_cast %43 : vector<8x8x32xbf16> to vector<64x32xbf16>
    %c0_31 = arith.constant 0 : index
    %c7 = arith.constant 7 : index
    %c0_32 = arith.constant 0 : index
    %c0_33 = arith.constant 0 : index
    %45 = vector.load %arg3[%c0_31, %c7, %c0_32, %c0_33] : memref<1x9x32x32xbf16, #tpu.memory_space<vmem>>, vector<1x1x32x32xbf16>
    %46 = vector.shape_cast %45 : vector<1x1x32x32xbf16> to vector<32x32xbf16>
    %cst_34 = arith.constant dense<0.000000e+00> : vector<64x32xf32>
    %47 = tpu.matmul %44, %46, %cst_34 {dimension_numbers = #tpu.dot_dimension_numbers<[1], [0], [0], [1], [0, 0, 1, 1], [], []>} : vector<64x32xbf16>, vector<32x32xbf16>, vector<64x32xf32> -> vector<64x32xf32>
    %48 = arith.addf %42, %47 : vector<64x32xf32>
    %49 = vector.extract_strided_slice %1 {offsets = [2, 2, 0], sizes = [8, 8, 32], strides = [1, 1, 1]} : vector<10x10x32xbf16> to vector<8x8x32xbf16>
    %50 = vector.shape_cast %49 : vector<8x8x32xbf16> to vector<64x32xbf16>
    %c0_35 = arith.constant 0 : index
    %c8 = arith.constant 8 : index
    %c0_36 = arith.constant 0 : index
    %c0_37 = arith.constant 0 : index
    %51 = vector.load %arg3[%c0_35, %c8, %c0_36, %c0_37] : memref<1x9x32x32xbf16, #tpu.memory_space<vmem>>, vector<1x1x32x32xbf16>
    %52 = vector.shape_cast %51 : vector<1x1x32x32xbf16> to vector<32x32xbf16>
    %cst_38 = arith.constant dense<0.000000e+00> : vector<64x32xf32>
    %53 = tpu.matmul %50, %52, %cst_38 {dimension_numbers = #tpu.dot_dimension_numbers<[1], [0], [0], [1], [0, 0, 1, 1], [], []>} : vector<64x32xbf16>, vector<32x32xbf16>, vector<64x32xf32> -> vector<64x32xf32>
    %54 = arith.addf %48, %53 : vector<64x32xf32>
    %c0_39 = arith.constant 0 : index
    %c0_40 = arith.constant 0 : index
    %55 = vector.load %arg4[%c0_39, %c0_40] : memref<1x32xf32, #tpu.memory_space<vmem>>, vector<1x32xf32>
    %56 = vector.broadcast %55 : vector<1x32xf32> to vector<64x32xf32>
    %57 = arith.mulf %54, %56 : vector<64x32xf32>
    %c0_41 = arith.constant 0 : index
    %c0_42 = arith.constant 0 : index
    %58 = vector.load %arg5[%c0_41, %c0_42] : memref<1x32xf32, #tpu.memory_space<vmem>>, vector<1x32xf32>
    %59 = vector.broadcast %58 : vector<1x32xf32> to vector<64x32xf32>
    %60 = arith.addf %57, %59 : vector<64x32xf32>
    %cst_43 = arith.constant 0.000000e+00 : f32
    %61 = vector.broadcast %cst_43 : f32 to vector<64x32xf32>
    %62 = arith.maximumf %60, %61 : vector<64x32xf32>
    %63 = vector.shape_cast %62 : vector<64x32xf32> to vector<8x8x32xf32>
    %64 = arith.truncf %63 : vector<8x8x32xf32> to vector<8x8x32xbf16>
    %c0_44 = arith.constant 0 : index
    %c0_45 = arith.constant 0 : index
    %c0_46 = arith.constant 0 : index
    %c0_47 = arith.constant 0 : index
    %65 = vector.load %arg6[%c0_44, %c0_45, %c0_46, %c0_47] : memref<1x8x8x32xbf16, #tpu.memory_space<vmem>>, vector<1x8x8x32xbf16>
    %66 = vector.shape_cast %65 : vector<1x8x8x32xbf16> to vector<8x8x32xbf16>
    %67 = vector.shape_cast %64 : vector<8x8x32xbf16> to vector<1x8x8x32xbf16>
    tpu.vector_store %arg6[%c0_44, %c0_45, %c0_46, %c0_47], %67 {strides = array<i32>} : memref<1x8x8x32xbf16, #tpu.memory_space<vmem>>, vector<1x8x8x32xbf16>,
    return
  }
  func.func @transform_0(%arg0: i32, %arg1: i32) -> (i32, i32, i32, i32) {
    %c0_i32 = arith.constant 0 : i32
    %c0_i32_0 = arith.constant 0 : i32
    %c0_i32_1 = arith.constant 0 : i32
    return %arg0, %c0_i32, %c0_i32_0, %arg1 : i32, i32, i32, i32
  }
  func.func @transform_1(%arg0: i32, %arg1: i32) -> (i32, i32, i32, i32) {
    %c0_i32 = arith.constant 0 : i32
    %c0_i32_0 = arith.constant 0 : i32
    %c0_i32_1 = arith.constant 0 : i32
    %c0_i32_2 = arith.constant 0 : i32
    return %arg1, %c0_i32, %c0_i32_0, %c0_i32_1 : i32, i32, i32, i32
  }
  func.func @transform_2(%arg0: i32, %arg1: i32) -> (i32, i32) {
    %c0_i32 = arith.constant 0 : i32
    %c0_i32_0 = arith.constant 0 : i32
    return %c0_i32, %arg1 : i32, i32
  }
  func.func @transform_3(%arg0: i32, %arg1: i32) -> (i32, i32) {
    %c0_i32 = arith.constant 0 : i32
    %c0_i32_0 = arith.constant 0 : i32
    return %c0_i32, %arg1 : i32, i32
  }
  func.func @transform_4(%arg0: i32, %arg1: i32) -> (i32, i32, i32, i32) {
    %c0_i32 = arith.constant 0 : i32
    %c0_i32_0 = arith.constant 0 : i32
    %c0_i32_1 = arith.constant 0 : i32
    return %arg0, %c0_i32, %c0_i32_0, %arg1 : i32, i32, i32, i32
  }
}

module attributes {stable_mosaic.version = 11 : i64} {
  func.func @_expand_bn_pool_kernel(%arg0: i32, %arg1: i32, %arg2: memref<1x64x32xbf16, #tpu.memory_space<vmem>>, %arg3: memref<32x64xbf16, #tpu.memory_space<vmem>>, %arg4: memref<1x64xf32, #tpu.memory_space<vmem>>, %arg5: memref<1x64xf32, #tpu.memory_space<vmem>>, %arg6: memref<1x64x64xbf16, #tpu.memory_space<vmem>>, %arg7: memref<1x1x64xf32, #tpu.memory_space<vmem>>, %arg8: memref<1x64xf32, #tpu.memory_space<vmem>>) attributes {dimension_semantics = [#tpu.dimension_semantics<parallel>, #tpu.dimension_semantics<arbitrary>], iteration_bounds = array<i64: 2, 1>, scalar_prefetch = 0 : i64, scratch_operands = 1 : i64, tpu.core_type = #tpu.core_type<tc>, window_params = [{transform_indices = @transform_0, window_bounds = array<i64: 1, 64, 32>}, {pipeline_mode = #tpu.pipeline_mode<synchronous>, transform_indices = @transform_1, window_bounds = array<i64: 32, 64>}, {pipeline_mode = #tpu.pipeline_mode<synchronous>, transform_indices = @transform_2, window_bounds = array<i64: 1, 64>}, {pipeline_mode = #tpu.pipeline_mode<synchronous>, transform_indices = @transform_3, window_bounds = array<i64: 1, 64>}, {transform_indices = @transform_4, window_bounds = array<i64: 1, 64, 64>}, {transform_indices = @transform_5, window_bounds = array<i64: 1, 1, 64>}]} {
    %c0_i32 = arith.constant 0 : i32
    %0 = arith.cmpi eq, %arg1, %c0_i32 : i32
    %1 = arith.extui %0 : i1 to i32
    %c0_i32_0 = arith.constant 0 : i32
    %2 = arith.cmpi ne, %1, %c0_i32_0 : i32
    scf.if %2 {
      %cst_19 = arith.constant 0.000000e+00 : f32
      %25 = vector.broadcast %cst_19 : f32 to vector<1x64xf32>
      %c0_20 = arith.constant 0 : index
      %c0_21 = arith.constant 0 : index
      %26 = vector.load %arg8[%c0_20, %c0_21] : memref<1x64xf32, #tpu.memory_space<vmem>>, vector<1x64xf32>
      tpu.vector_store %arg8[%c0_20, %c0_21], %25 {strides = array<i32>} : memref<1x64xf32, #tpu.memory_space<vmem>>, vector<1x64xf32>,
    } else {
    }
    %c0 = arith.constant 0 : index
    %c0_1 = arith.constant 0 : index
    %c0_2 = arith.constant 0 : index
    %3 = vector.load %arg2[%c0, %c0_1, %c0_2] : memref<1x64x32xbf16, #tpu.memory_space<vmem>>, vector<1x64x32xbf16>
    %4 = vector.shape_cast %3 : vector<1x64x32xbf16> to vector<64x32xbf16>
    %c0_3 = arith.constant 0 : index
    %c0_4 = arith.constant 0 : index
    %5 = vector.load %arg3[%c0_3, %c0_4] : memref<32x64xbf16, #tpu.memory_space<vmem>>, vector<32x64xbf16>
    %cst = arith.constant dense<0.000000e+00> : vector<64x64xf32>
    %6 = tpu.matmul %4, %5, %cst {dimension_numbers = #tpu.dot_dimension_numbers<[1], [0], [0], [1], [0, 0, 1, 1], [], []>} : vector<64x32xbf16>, vector<32x64xbf16>, vector<64x64xf32> -> vector<64x64xf32>
    %c0_5 = arith.constant 0 : index
    %c0_6 = arith.constant 0 : index
    %7 = vector.load %arg4[%c0_5, %c0_6] : memref<1x64xf32, #tpu.memory_space<vmem>>, vector<1x64xf32>
    %8 = vector.broadcast %7 : vector<1x64xf32> to vector<64x64xf32>
    %9 = arith.mulf %6, %8 : vector<64x64xf32>
    %c0_7 = arith.constant 0 : index
    %c0_8 = arith.constant 0 : index
    %10 = vector.load %arg5[%c0_7, %c0_8] : memref<1x64xf32, #tpu.memory_space<vmem>>, vector<1x64xf32>
    %11 = vector.broadcast %10 : vector<1x64xf32> to vector<64x64xf32>
    %12 = arith.addf %9, %11 : vector<64x64xf32>
    %13 = arith.truncf %12 : vector<64x64xf32> to vector<64x64xbf16>
    %c0_9 = arith.constant 0 : index
    %c0_10 = arith.constant 0 : index
    %c0_11 = arith.constant 0 : index
    %14 = vector.load %arg6[%c0_9, %c0_10, %c0_11] : memref<1x64x64xbf16, #tpu.memory_space<vmem>>, vector<1x64x64xbf16>
    %15 = vector.shape_cast %14 : vector<1x64x64xbf16> to vector<64x64xbf16>
    %16 = vector.shape_cast %13 : vector<64x64xbf16> to vector<1x64x64xbf16>
    tpu.vector_store %arg6[%c0_9, %c0_10, %c0_11], %16 {strides = array<i32>} : memref<1x64x64xbf16, #tpu.memory_space<vmem>>, vector<1x64x64xbf16>,
    %c0_12 = arith.constant 0 : index
    %c0_13 = arith.constant 0 : index
    %17 = vector.load %arg8[%c0_12, %c0_13] : memref<1x64xf32, #tpu.memory_space<vmem>>, vector<1x64xf32>
    %cst_14 = arith.constant dense<0.000000e+00> : vector<64xf32>
    %18 = vector.multi_reduction <add>, %12, %cst_14 [0] : vector<64x64xf32> to vector<64xf32>
    %19 = vector.shape_cast %18 : vector<64xf32> to vector<1x64xf32>
    %20 = arith.addf %17, %19 : vector<1x64xf32>
    %c0_15 = arith.constant 0 : index
    %c0_16 = arith.constant 0 : index
    %21 = vector.load %arg8[%c0_15, %c0_16] : memref<1x64xf32, #tpu.memory_space<vmem>>, vector<1x64xf32>
    tpu.vector_store %arg8[%c0_15, %c0_16], %20 {strides = array<i32>} : memref<1x64xf32, #tpu.memory_space<vmem>>, vector<1x64xf32>,
    %c0_i32_17 = arith.constant 0 : i32
    %22 = arith.cmpi eq, %arg1, %c0_i32_17 : i32
    %23 = arith.extui %22 : i1 to i32
    %c0_i32_18 = arith.constant 0 : i32
    %24 = arith.cmpi ne, %23, %c0_i32_18 : i32
    scf.if %24 {
      %c0_19 = arith.constant 0 : index
      %c0_20 = arith.constant 0 : index
      %25 = vector.load %arg8[%c0_19, %c0_20] : memref<1x64xf32, #tpu.memory_space<vmem>>, vector<1x64xf32>
      %c0_21 = arith.constant 0 : index
      %c0_22 = arith.constant 0 : index
      %c0_23 = arith.constant 0 : index
      %26 = vector.load %arg7[%c0_21, %c0_22, %c0_23] : memref<1x1x64xf32, #tpu.memory_space<vmem>>, vector<1x1x64xf32>
      %27 = vector.shape_cast %26 : vector<1x1x64xf32> to vector<1x64xf32>
      %28 = vector.shape_cast %25 : vector<1x64xf32> to vector<1x1x64xf32>
      tpu.vector_store %arg7[%c0_21, %c0_22, %c0_23], %28 {strides = array<i32>} : memref<1x1x64xf32, #tpu.memory_space<vmem>>, vector<1x1x64xf32>,
    } else {
    }
    return
  }
  func.func @transform_0(%arg0: i32, %arg1: i32) -> (i32, i32, i32) {
    %c0_i32 = arith.constant 0 : i32
    %c0_i32_0 = arith.constant 0 : i32
    return %arg0, %arg1, %c0_i32 : i32, i32, i32
  }
  func.func @transform_1(%arg0: i32, %arg1: i32) -> (i32, i32) {
    %c0_i32 = arith.constant 0 : i32
    %c0_i32_0 = arith.constant 0 : i32
    %c0_i32_1 = arith.constant 0 : i32
    return %c0_i32, %c0_i32_0 : i32, i32
  }
  func.func @transform_2(%arg0: i32, %arg1: i32) -> (i32, i32) {
    %c0_i32 = arith.constant 0 : i32
    %c0_i32_0 = arith.constant 0 : i32
    %c0_i32_1 = arith.constant 0 : i32
    return %c0_i32, %c0_i32_0 : i32, i32
  }
  func.func @transform_3(%arg0: i32, %arg1: i32) -> (i32, i32) {
    %c0_i32 = arith.constant 0 : i32
    %c0_i32_0 = arith.constant 0 : i32
    %c0_i32_1 = arith.constant 0 : i32
    return %c0_i32, %c0_i32_0 : i32, i32
  }
  func.func @transform_4(%arg0: i32, %arg1: i32) -> (i32, i32, i32) {
    %c0_i32 = arith.constant 0 : i32
    %c0_i32_0 = arith.constant 0 : i32
    return %arg0, %arg1, %c0_i32 : i32, i32, i32
  }
  func.func @transform_5(%arg0: i32, %arg1: i32) -> (i32, i32, i32) {
    %c0_i32 = arith.constant 0 : i32
    %c0_i32_0 = arith.constant 0 : i32
    %c0_i32_1 = arith.constant 0 : i32
    return %arg0, %c0_i32, %c0_i32_0 : i32, i32, i32
  }
}

module attributes {stable_mosaic.version = 11 : i64} {
  func.func @_se_gate_kernel(%arg0: memref<2x64xf32, #tpu.memory_space<vmem>>, %arg1: memref<64x4xf32, #tpu.memory_space<vmem>>, %arg2: memref<1x4xf32, #tpu.memory_space<vmem>>, %arg3: memref<4x64xf32, #tpu.memory_space<vmem>>, %arg4: memref<1x64xf32, #tpu.memory_space<vmem>>, %arg5: memref<2x64xf32, #tpu.memory_space<vmem>>) attributes {dimension_semantics = [], scalar_prefetch = 0 : i64, scratch_operands = 0 : i64, tpu.core_type = #tpu.core_type<tc>} {
    %c0 = arith.constant 0 : index
    %c0_0 = arith.constant 0 : index
    %0 = vector.load %arg0[%c0, %c0_0] : memref<2x64xf32, #tpu.memory_space<vmem>>, vector<2x64xf32>
    %cst = arith.constant 1.562500e-02 : f32
    %1 = vector.broadcast %cst : f32 to vector<2x64xf32>
    %2 = arith.mulf %0, %1 : vector<2x64xf32>
    %c0_1 = arith.constant 0 : index
    %c0_2 = arith.constant 0 : index
    %3 = vector.load %arg1[%c0_1, %c0_2] : memref<64x4xf32, #tpu.memory_space<vmem>>, vector<64x4xf32>
    %cst_3 = arith.constant dense<0.000000e+00> : vector<2x4xf32>
    %4 = tpu.matmul %2, %3, %cst_3 {dimension_numbers = #tpu.dot_dimension_numbers<[1], [0], [0], [1], [0, 0, 1, 1], [], []>} : vector<2x64xf32>, vector<64x4xf32>, vector<2x4xf32> -> vector<2x4xf32>
    %c0_4 = arith.constant 0 : index
    %c0_5 = arith.constant 0 : index
    %5 = vector.load %arg2[%c0_4, %c0_5] : memref<1x4xf32, #tpu.memory_space<vmem>>, vector<1x4xf32>
    %6 = vector.broadcast %5 : vector<1x4xf32> to vector<2x4xf32>
    %7 = arith.addf %4, %6 : vector<2x4xf32>
    %cst_6 = arith.constant 0.000000e+00 : f32
    %8 = vector.broadcast %cst_6 : f32 to vector<2x4xf32>
    %9 = arith.maximumf %7, %8 : vector<2x4xf32>
    %c0_7 = arith.constant 0 : index
    %c0_8 = arith.constant 0 : index
    %10 = vector.load %arg3[%c0_7, %c0_8] : memref<4x64xf32, #tpu.memory_space<vmem>>, vector<4x64xf32>
    %cst_9 = arith.constant dense<0.000000e+00> : vector<2x64xf32>
    %11 = tpu.matmul %9, %10, %cst_9 {dimension_numbers = #tpu.dot_dimension_numbers<[1], [0], [0], [1], [0, 0, 1, 1], [], []>} : vector<2x4xf32>, vector<4x64xf32>, vector<2x64xf32> -> vector<2x64xf32>
    %c0_10 = arith.constant 0 : index
    %c0_11 = arith.constant 0 : index
    %12 = vector.load %arg4[%c0_10, %c0_11] : memref<1x64xf32, #tpu.memory_space<vmem>>, vector<1x64xf32>
    %13 = vector.broadcast %12 : vector<1x64xf32> to vector<2x64xf32>
    %14 = arith.addf %11, %13 : vector<2x64xf32>
    %15 = arith.negf %14 : vector<2x64xf32>
    %16 = math.exp %15 : vector<2x64xf32>
    %cst_12 = arith.constant 1.000000e+00 : f32
    %17 = vector.broadcast %cst_12 : f32 to vector<2x64xf32>
    %18 = arith.addf %17, %16 : vector<2x64xf32>
    %19 = arith.divf %17, %18 : vector<2x64xf32>
    %c0_13 = arith.constant 0 : index
    %c0_14 = arith.constant 0 : index
    %20 = vector.load %arg5[%c0_13, %c0_14] : memref<2x64xf32, #tpu.memory_space<vmem>>, vector<2x64xf32>
    tpu.vector_store %arg5[%c0_13, %c0_14], %19 {strides = array<i32>} : memref<2x64xf32, #tpu.memory_space<vmem>>, vector<2x64xf32>,
    return
  }
}

module attributes {stable_mosaic.version = 11 : i64} {
  func.func @_gate_res_proj_kernel(%arg0: i32, %arg1: i32, %arg2: memref<1x64x64xbf16, #tpu.memory_space<vmem>>, %arg3: memref<1x64x32xbf16, #tpu.memory_space<vmem>>, %arg4: memref<32x64xbf16, #tpu.memory_space<vmem>>, %arg5: memref<1x64xf32, #tpu.memory_space<vmem>>, %arg6: memref<1x64xf32, #tpu.memory_space<vmem>>, %arg7: memref<1x1x64xf32, #tpu.memory_space<vmem>>, %arg8: memref<1x64x64xbf16, #tpu.memory_space<vmem>>) attributes {dimension_semantics = [#tpu.dimension_semantics<parallel>, #tpu.dimension_semantics<parallel>], iteration_bounds = array<i64: 2, 1>, scalar_prefetch = 0 : i64, scratch_operands = 0 : i64, tpu.core_type = #tpu.core_type<tc>, window_params = [{transform_indices = @transform_0, window_bounds = array<i64: 1, 64, 64>}, {transform_indices = @transform_1, window_bounds = array<i64: 1, 64, 32>}, {pipeline_mode = #tpu.pipeline_mode<synchronous>, transform_indices = @transform_2, window_bounds = array<i64: 32, 64>}, {pipeline_mode = #tpu.pipeline_mode<synchronous>, transform_indices = @transform_3, window_bounds = array<i64: 1, 64>}, {pipeline_mode = #tpu.pipeline_mode<synchronous>, transform_indices = @transform_4, window_bounds = array<i64: 1, 64>}, {transform_indices = @transform_5, window_bounds = array<i64: 1, 1, 64>}, {transform_indices = @transform_6, window_bounds = array<i64: 1, 64, 64>}]} {
    %c0 = arith.constant 0 : index
    %c0_0 = arith.constant 0 : index
    %c0_1 = arith.constant 0 : index
    %0 = vector.load %arg3[%c0, %c0_0, %c0_1] : memref<1x64x32xbf16, #tpu.memory_space<vmem>>, vector<1x64x32xbf16>
    %1 = vector.shape_cast %0 : vector<1x64x32xbf16> to vector<64x32xbf16>
    %c0_2 = arith.constant 0 : index
    %c0_3 = arith.constant 0 : index
    %2 = vector.load %arg4[%c0_2, %c0_3] : memref<32x64xbf16, #tpu.memory_space<vmem>>, vector<32x64xbf16>
    %cst = arith.constant dense<0.000000e+00> : vector<64x64xf32>
    %3 = tpu.matmul %1, %2, %cst {dimension_numbers = #tpu.dot_dimension_numbers<[1], [0], [0], [1], [0, 0, 1, 1], [], []>} : vector<64x32xbf16>, vector<32x64xbf16>, vector<64x64xf32> -> vector<64x64xf32>
    %c0_4 = arith.constant 0 : index
    %c0_5 = arith.constant 0 : index
    %4 = vector.load %arg5[%c0_4, %c0_5] : memref<1x64xf32, #tpu.memory_space<vmem>>, vector<1x64xf32>
    %5 = vector.broadcast %4 : vector<1x64xf32> to vector<64x64xf32>
    %6 = arith.mulf %3, %5 : vector<64x64xf32>
    %c0_6 = arith.constant 0 : index
    %c0_7 = arith.constant 0 : index
    %7 = vector.load %arg6[%c0_6, %c0_7] : memref<1x64xf32, #tpu.memory_space<vmem>>, vector<1x64xf32>
    %8 = vector.broadcast %7 : vector<1x64xf32> to vector<64x64xf32>
    %9 = arith.addf %6, %8 : vector<64x64xf32>
    %c0_8 = arith.constant 0 : index
    %c0_9 = arith.constant 0 : index
    %c0_10 = arith.constant 0 : index
    %10 = vector.load %arg2[%c0_8, %c0_9, %c0_10] : memref<1x64x64xbf16, #tpu.memory_space<vmem>>, vector<1x64x64xbf16>
    %11 = vector.shape_cast %10 : vector<1x64x64xbf16> to vector<64x64xbf16>
    %12 = arith.extf %11 : vector<64x64xbf16> to vector<64x64xf32>
    %c0_11 = arith.constant 0 : index
    %c0_12 = arith.constant 0 : index
    %c0_13 = arith.constant 0 : index
    %13 = vector.load %arg7[%c0_11, %c0_12, %c0_13] : memref<1x1x64xf32, #tpu.memory_space<vmem>>, vector<1x1x64xf32>
    %14 = vector.shape_cast %13 : vector<1x1x64xf32> to vector<1x64xf32>
    %15 = vector.broadcast %14 : vector<1x64xf32> to vector<64x64xf32>
    %16 = arith.mulf %12, %15 : vector<64x64xf32>
    %17 = arith.addf %16, %9 : vector<64x64xf32>
    %cst_14 = arith.constant 0.000000e+00 : f32
    %18 = vector.broadcast %cst_14 : f32 to vector<64x64xf32>
    %19 = arith.maximumf %17, %18 : vector<64x64xf32>
    %20 = arith.truncf %19 : vector<64x64xf32> to vector<64x64xbf16>
    %c0_15 = arith.constant 0 : index
    %c0_16 = arith.constant 0 : index
    %c0_17 = arith.constant 0 : index
    %21 = vector.load %arg8[%c0_15, %c0_16, %c0_17] : memref<1x64x64xbf16, #tpu.memory_space<vmem>>, vector<1x64x64xbf16>
    %22 = vector.shape_cast %21 : vector<1x64x64xbf16> to vector<64x64xbf16>
    %23 = vector.shape_cast %20 : vector<64x64xbf16> to vector<1x64x64xbf16>
    tpu.vector_store %arg8[%c0_15, %c0_16, %c0_17], %23 {strides = array<i32>} : memref<1x64x64xbf16, #tpu.memory_space<vmem>>, vector<1x64x64xbf16>,
    return
  }
  func.func @transform_0(%arg0: i32, %arg1: i32) -> (i32, i32, i32) {
    %c0_i32 = arith.constant 0 : i32
    %c0_i32_0 = arith.constant 0 : i32
    return %arg0, %arg1, %c0_i32 : i32, i32, i32
  }
  func.func @transform_1(%arg0: i32, %arg1: i32) -> (i32, i32, i32) {
    %c0_i32 = arith.constant 0 : i32
    %c0_i32_0 = arith.constant 0 : i32
    return %arg0, %arg1, %c0_i32 : i32, i32, i32
  }
  func.func @transform_2(%arg0: i32, %arg1: i32) -> (i32, i32) {
    %c0_i32 = arith.constant 0 : i32
    %c0_i32_0 = arith.constant 0 : i32
    %c0_i32_1 = arith.constant 0 : i32
    return %c0_i32, %c0_i32_0 : i32, i32
  }
  func.func @transform_3(%arg0: i32, %arg1: i32) -> (i32, i32) {
    %c0_i32 = arith.constant 0 : i32
    %c0_i32_0 = arith.constant 0 : i32
    %c0_i32_1 = arith.constant 0 : i32
    return %c0_i32, %c0_i32_0 : i32, i32
  }
  func.func @transform_4(%arg0: i32, %arg1: i32) -> (i32, i32) {
    %c0_i32 = arith.constant 0 : i32
    %c0_i32_0 = arith.constant 0 : i32
    %c0_i32_1 = arith.constant 0 : i32
    return %c0_i32, %c0_i32_0 : i32, i32
  }
  func.func @transform_5(%arg0: i32, %arg1: i32) -> (i32, i32, i32) {
    %c0_i32 = arith.constant 0 : i32
    %c0_i32_0 = arith.constant 0 : i32
    %c0_i32_1 = arith.constant 0 : i32
    return %arg0, %c0_i32, %c0_i32_0 : i32, i32, i32
  }
  func.func @transform_6(%arg0: i32, %arg1: i32) -> (i32, i32, i32) {
    %c0_i32 = arith.constant 0 : i32
    %c0_i32_0 = arith.constant 0 : i32
    return %arg0, %arg1, %c0_i32 : i32, i32, i32
  }
}

</mosaic_0001>

<bundles_post_ra>
// kernel: bottleneck_forward.5
= control target key start
LH: loop header
LB: loop body
LE: loop exit
PB: predicated region body
PF: predicated region fallthrough
CT: control target
= control target key end

     0   :  { %vm90_vm0 = vcmask 261120   ;;  %vm338_vm1 = vcmask 257024   ;;  %s624_s1 = inlined_call_operand.vmem [shape: bf16[32,32], index: 1, kind: input, shape index: {}]   ;;  %s625_s0 = inlined_call_operand.vmem [shape: bf16[128,32], index: 0, kind: input, shape index: {}]   ;;  %s626_s2 = inlined_call_operand.vmem [shape: f32[1,32], index: 2, kind: input, shape index: {}]   ;;  %s627_s3 = inlined_call_operand.vmem [shape: f32[1,32], index: 3, kind: input, shape index: {}]   ;;  %s628_s4 = inlined_call_operand.vmem [shape: bf16[128,32], index: 4, kind: output, shape index: {}]  }
   0x1   :  { %v445_v0 = vld [vmem:[%s624_s1 + $0x8] sm:$0xff]   ;;  %v446_v1 = vld [vmem:[%s624_s1] sm:$0xff]   ;;  %v451_v6 = vld [vmem:[%s625_s0 + $0x10] sm:$0xff]  }
   0x2   :  { %421 = vmatprep.subr.bf16.mxu0 %v445_v0  ;;  %441 = vmatprep.subr.bf16.mxu1 %v445_v0  ;;  %v447_v2 = vld [vmem:[%s625_s0] sm:$0xff]   ;;  %v449_v4 = vld [vmem:[%s625_s0 + $0x8] sm:$0xff]   ;;  %v452_v7 = vld [vmem:[%s625_s0 + $0x30] sm:$0xff]  }
   0x3   :  { %422 = vmatpush3.bf16.msra.mxu0 %v445_v0  ;;  %443 = vmatpush3.bf16.msra.mxu1 %v445_v0  ;;  %v448_v3 = vld [vmem:[%s625_s0 + $0x20] sm:$0xff]   ;;  %v450_v5 = vld [vmem:[%s625_s0 + $0x28] sm:$0xff]   ;;  %v453_v8 = vld [vmem:[%s625_s0 + $0x18] sm:$0xff]  }
   0x4   :  { %423 = vmatprep.subr.bf16.mxu0 %v446_v1  ;;  %442 = vmatprep.subr.bf16.mxu1 %v446_v1  ;;  %v454_v9 = vld [vmem:[%s625_s0 + $0x38] sm:$0xff]   ;;  %v521_v10 = vld [vmem:[%s626_s2] ss:$0 sm:$0xff] }
   0x5   :  { %425 = vmatprep.mubr.msk.bf16.mxu0 %vm90_vm0, %v447_v2  ;;  %433 = vmatprep.mubr.msk.bf16.mxu1 %vm90_vm0, %v448_v3  ;;  %v526_v12 = vld [vmem:[%s627_s3] ss:$0 sm:$0xff] }
   0x7   :  { %424 = vmatpush3.bf16.msra.mxu0 %v446_v1  ;;  %444 = vmatpush3.bf16.msra.mxu1 %v446_v1 }
   0xa   :  { %426 = vmatmul.mubr.msk.bf16.vlgmr.msra.gmra.mxu0 %vm90_vm0, %v449_v4  ;;  %434 = vmatmul.mubr.msk.bf16.vlgmr.msra.gmra.mxu1 %vm90_vm0, %v450_v5 }
   0xb   :  { %429 = vmatprep.mubr.msk.bf16.mxu0 %vm90_vm0, %v451_v6  ;;  %437 = vmatprep.mubr.msk.bf16.mxu1 %vm90_vm0, %v452_v7 }
  0x12   :  { %430 = vmatmul.mubr.msk.bf16.gmra.mxu0 %vm90_vm0, %v453_v8  ;;  %438 = vmatmul.mubr.msk.bf16.gmra.mxu1 %vm90_vm0, %v454_v9 }
  0xca   :  { %v427_v11 = vpop.f32.mrf.mxu0  ;;  %v435_v13 = vpop.f32.mrf.mxu1 }
  0xcb   :  { %v221_v14 = vmul.f32 %v427_v11, %v521_v10  ;;  %v229_v15 = vmul.f32 %v435_v13, %v521_v10 }
  0xcc   :  { %v149_v16 = vpop.f32.mrf.mxu0  ;;  %v181_v17 = vpop.f32.mrf.mxu1 }
  0xcd   :  { %v244_v18 = vadd.f32 %v526_v12, %v221_v14  ;;  %v252_v19 = vadd.f32 %v526_v12, %v229_v15  ;;  %v219_v20 = vmul.f32 %v521_v10, %v149_v16  ;;  %v227_v21 = vmul.f32 %v521_v10, %v181_v17 }
  0xce   :  { %v428_v22 = vpop.f32.mrf.mxu0  ;;  %v436_v23 = vpop.f32.mrf.mxu1 }
  0xcf   :  { %v260_v24 = vmax.f32 %v244_v18, 0.0  ;;  %v268_v25 = vmax.f32 %v252_v19, 0.0  ;;  %v242_v26 = vadd.f32 %v526_v12, %v219_v20  ;;  %v250_v27 = vadd.f32 %v526_v12, %v227_v21 }
  0xd0   :  { %v222_v28 = vmul.f32 %v428_v22, %v521_v10  ;;  %v230_v29 = vmul.f32 %v436_v23, %v521_v10  ;;  %v152_v30 = vpop.f32.mrf.mxu0  ;;  %v184_v31 = vpop.f32.mrf.mxu1 }
  0xd1   :  { %v397_v32 = vpack.c.bf16 %v260_v24, %v260_v24  ;;  %v405_v33 = vpack.c.bf16 %v268_v25, %v268_v25  ;;  %v258_v34 = vmax.f32 %v242_v26, 0.0  ;;  %v266_v35 = vmax.f32 %v250_v27, 0.0 }
  0xd2   :  { %v245_v36 = vadd.f32 %v526_v12, %v222_v28  ;;  %v253_v37 = vadd.f32 %v526_v12, %v230_v29  ;;  %v220_v38 = vmul.f32 %v521_v10, %v152_v30  ;;  %v228_v39 = vmul.f32 %v521_v10, %v184_v31  ;;  %v431_v40 = vpop.f32.mrf.mxu0  ;;  %v439_v41 = vpop.f32.mrf.mxu1 }
  0xd3   :  { %341 = vst.msk [vmem:[%s628_s4 + $0x8] sm:$0xf] %vm338_vm1, %v397_v32  ;;  %349 = vst.msk [vmem:[%s628_s4 + $0x28] sm:$0xf] %vm338_vm1, %v405_v33  ;;  %v395_v42 = vpack.c.bf16 %v258_v34, %v258_v34  ;;  %v403_v43 = vpack.c.bf16 %v266_v35, %v266_v35  ;;  %v225_v44 = vmul.f32 %v431_v40, %v521_v10 }
  0xd4   :  { %v233_v45 = vmul.f32 %v439_v41, %v521_v10  ;;  %v261_v46 = vmax.f32 %v245_v36, 0.0  ;;  %v269_v47 = vmax.f32 %v253_v37, 0.0  ;;  %v243_v48 = vadd.f32 %v526_v12, %v220_v38  ;;  %v165_v50 = vpop.f32.mrf.mxu0  ;;  %v197_v51 = vpop.f32.mrf.mxu1 }
  0xd5   :  { %v251_v49 = vadd.f32 %v526_v12, %v228_v39  ;;  %339 = vst.msk [vmem:[%s628_s4] sm:$0xf] %vm338_vm1, %v395_v42  ;;  %347 = vst.msk [vmem:[%s628_s4 + $0x20] sm:$0xf] %vm338_vm1, %v403_v43  ;;  %v248_v52 = vadd.f32 %v526_v12, %v225_v44  ;;  %v223_v54 = vmul.f32 %v521_v10, %v165_v50 }
  0xd6   :  { %v256_v53 = vadd.f32 %v526_v12, %v233_v45  ;;  %v231_v55 = vmul.f32 %v521_v10, %v197_v51  ;;  %v398_v56 = vpack.c.bf16 %v261_v46, %v261_v46  ;;  %v406_v57 = vpack.c.bf16 %v269_v47, %v269_v47  ;;  %v432_v60 = vpop.f32.mrf.mxu0  ;;  %v440_v61 = vpop.f32.mrf.mxu1 }
  0xd7   :  { %v259_v58 = vmax.f32 %v243_v48, 0.0  ;;  %v267_v59 = vmax.f32 %v251_v49, 0.0  ;;  %v264_v62 = vmax.f32 %v248_v52, 0.0  ;;  %v246_v0 = vadd.f32 %v526_v12, %v223_v54 }
  0xd8   :  { %v272_v63 = vmax.f32 %v256_v53, 0.0  ;;  %v254_v1 = vadd.f32 %v526_v12, %v231_v55  ;;  %342 = vst.msk [vmem:[%s628_s4 + $0xc] sm:$0xf] %vm338_vm1, %v398_v56  ;;  %350 = vst.msk [vmem:[%s628_s4 + $0x2c] sm:$0xf] %vm338_vm1, %v406_v57  ;;  %v226_v4 = vmul.f32 %v432_v60, %v521_v10  ;;  %v234_v5 = vmul.f32 %v440_v61, %v521_v10  ;;  %v168_v6 = vpop.f32.mrf.mxu0  ;;  %v200_v7 = vpop.f32.mrf.mxu1 }
  0xd9   :  { %v396_v2 = vpack.c.bf16 %v259_v58, %v259_v58  ;;  %v404_v3 = vpack.c.bf16 %v267_v59, %v267_v59  ;;  %v401_v8 = vpack.c.bf16 %v264_v62, %v264_v62  ;;  %v262_v11 = vmax.f32 %v246_v0, 0.0 }
  0xda   :  { %v409_v9 = vpack.c.bf16 %v272_v63, %v272_v63  ;;  %v270_v13 = vmax.f32 %v254_v1, 0.0  ;;  %v249_v14 = vadd.f32 %v526_v12, %v226_v4  ;;  %v257_v15 = vadd.f32 %v526_v12, %v234_v5 }
  0xdb   :  { %340 = vst.msk [vmem:[%s628_s4 + $0x4] sm:$0xf] %vm338_vm1, %v396_v2  ;;  %348 = vst.msk [vmem:[%s628_s4 + $0x24] sm:$0xf] %vm338_vm1, %v404_v3  ;;  %v224_v16 = vmul.f32 %v521_v10, %v168_v6  ;;  %v232_v17 = vmul.f32 %v521_v10, %v200_v7  ;;  %v399_v18 = vpack.c.bf16 %v262_v11, %v262_v11 }
  0xdc   :  { %345 = vst.msk [vmem:[%s628_s4 + $0x18] sm:$0xf] %vm338_vm1, %v401_v8  ;;  %353 = vst.msk [vmem:[%s628_s4 + $0x38] sm:$0xf] %vm338_vm1, %v409_v9  ;;  %v407_v19 = vpack.c.bf16 %v270_v13, %v270_v13  ;;  %v265_v20 = vmax.f32 %v249_v14, 0.0  ;;  %v273_v21 = vmax.f32 %v257_v15, 0.0 }
  0xdd   :  { %v247_v22 = vadd.f32 %v526_v12, %v224_v16  ;;  %v255_v23 = vadd.f32 %v526_v12, %v232_v17  ;;  %343 = vst.msk [vmem:[%s628_s4 + $0x10] sm:$0xf] %vm338_vm1, %v399_v18 }
  0xde   :  { %351 = vst.msk [vmem:[%s628_s4 + $0x30] sm:$0xf] %vm338_vm1, %v407_v19  ;;  %v402_v10 = vpack.c.bf16 %v265_v20, %v265_v20  ;;  %v410_v24 = vpack.c.bf16 %v273_v21, %v273_v21 }
  0xdf   :  { %v263_v25 = vmax.f32 %v247_v22, 0.0  ;;  %v271_v26 = vmax.f32 %v255_v23, 0.0 }
  0xe0   :  { %346 = vst.msk [vmem:[%s628_s4 + $0x1c] sm:$0xf] %vm338_vm1, %v402_v10  ;;  %354 = vst.msk [vmem:[%s628_s4 + $0x3c] sm:$0xf] %vm338_vm1, %v410_v24 }
  0xe1   :  { %v400_v12 = vpack.c.bf16 %v263_v25, %v263_v25  ;;  %v408_v27 = vpack.c.bf16 %v271_v26, %v271_v26 }
  0xe3   :  { %344 = vst.msk [vmem:[%s628_s4 + $0x14] sm:$0xf] %vm338_vm1, %v400_v12  ;;  %352 = vst.msk [vmem:[%s628_s4 + $0x34] sm:$0xf] %vm338_vm1, %v408_v27 }

// kernel: bottleneck_forward.7
= control target key start
LH: loop header
LB: loop body
LE: loop exit
PB: predicated region body
PF: predicated region fallthrough
CT: control target
= control target key end

     0   :  { %s765_s18 = smov 0   ;;  %s767_s19 = smov 0   ;;  %s846_s0 = inlined_call_operand.vmem [shape: bf16[2,64,32], index: 0, kind: input, shape index: {}]   ;;  %s847_s1 = inlined_call_operand.vmem [shape: bf16[32,64], index: 1, kind: input, shape index: {}]   ;;  %s848_s2 = inlined_call_operand.vmem [shape: f32[1,64], index: 2, kind: input, shape index: {}]   ;;  %s849_s3 = inlined_call_operand.vmem [shape: f32[1,64], index: 3, kind: input, shape index: {}]   ;;  %s850_s4 = inlined_call_operand.vmem [shape: bf16[2,64,64], index: 4, kind: output, shape index: {0}]   ;;  %s851_s5 = inlined_call_operand.vmem [shape: f32[2,1,64], index: 5, kind: output, shape index: {1}]  }
   0x1   :  { %s769_s20 = smov 0  }
   0x2 LB: > { %s28_s21 = sadd.s32 1, %s728_s19  ;;  %p620_p0 = scmp.ge.s32.totalorder %s732_s20, 1  ;;  %s732_s20 = sphi %s769_s20, %s16_s20   ;;  %s728_s19 = sphi %s767_s19, %s853_s19   ;;  %s724_s18 = sphi %s765_s18, %s852_s18  }
   0x3   : > { %p30_p1 = scmp.ge.s32.totalorder %s28_s21, 2  ;;  %p211_p2 = scmp.lt.s32.totalorder %s732_s20, 3 }
   0x5   : > { %s855_s21 = smov (%p30_p1, %s28_s21), 0  ;;  %p212_p3 = pnand %p620_p0, %p211_p2 }
   0x6   : > { %p251_p4 = scmp.lt.s32.totalorder (!%p212_p3), %s724_s18, 1 }
   0x7   : > { %215 = sbr.rel (%p212_p3) target bundleno = 262 (0x106), region = 36 }
   0xc   : > { %v704_v0 = vld [vmem:[%s847_s1 + $0x8] sm:$0xff]   ;;  %v705_v1 = vld [vmem:[%s847_s1] sm:$0xff]   ;;  %s857_s18 = smov (!%p251_p4, %s724_s18), 1  ;;  %vm324_vm0 = vcmask 261120   ;;  %vm278_vm1 = vcmask 516096   ;;  %v734_v6 = vmov 0.0  }
   0xd   : > { %663 = vmatprep.subr.bf16.mxu0 %v704_v0  ;;  %675 = vmatprep.subr.bf16.mxu1 %v704_v0  ;;  %s647_s26 = sshll.u32 %s857_s18, 5  ;;  %279 = vst.msk [vmem:[#allocation2] sm:$0x1] %vm278_vm1, %v734_v6  ;;  %v635_v7 = vld [vmem:[%s848_s2] ss:$0 sm:$0xff]  ;;  %vm464_vm2 = vcmask 519168   ;;  %s272_s14 = scalar_lea.vmem %s851_s5, %s857_s18 }
   0xe   : > { %664 = vmatpush3.bf16.msra.mxu0 %v704_v0  ;;  %677 = vmatpush3.bf16.msra.mxu1 %v704_v0  ;;  %s258_s29 = scalar_lea.vmem %s846_s0, %s647_s26  ;;  %v636_v9 = vld [vmem:[%s849_s3] ss:$0 sm:$0xff]  ;;  %s805_s11 = scalar_lea.vmem %s850_s4, %s647_s26  ;;  %vm474_vm3 = vcmask 523264  }
   0xf   : > { %665 = vmatprep.subr.bf16.mxu0 %v705_v1  ;;  %676 = vmatprep.subr.bf16.mxu1 %v705_v1  ;;  %v706_v2 = vld [vmem:[%s258_s29] sm:$0xff]   ;;  %v707_v3 = vld [vmem:[%s258_s29 + $0x8] sm:$0xff]   ;;  %v708_v4 = vld [vmem:[%s258_s29 + $0x10] sm:$0xff]  }
  0x10   : > { %667 = vmatprep.mubr.msk.bf16.mxu0 %vm324_vm0, %v706_v2  ;;  %v709_v5 = vld [vmem:[%s258_s29 + $0x18] sm:$0xff]   ;;  %671 = vmatprep.mubr.msk.bf16.mxu1 %vm324_vm0, %v708_v4 }
  0x12   : > { %666 = vmatpush3.bf16.msra.mxu0 %v705_v1  ;;  %678 = vmatpush3.bf16.msra.mxu1 %v705_v1 }
  0x14   : > { %v473_v61 = vld [vmem:[#allocation2] sm:$0x1] }
  0x15   : > { %668 = vmatmul.mubr.msk.bf16.vlgmr.msra.gmra.mxu0 %vm324_vm0, %v707_v3  ;;  %672 = vmatmul.mubr.msk.bf16.vlgmr.msra.gmra.mxu1 %vm324_vm0, %v709_v5 }
  0xd5   : > { %v669_v8 = vpop.f32.mrf.mxu0  ;;  %v673_v11 = vpop.f32.mrf.mxu1 }
  0xd6   : > { %v411_v10 = vmul.f32 %v669_v8, %v635_v7  ;;  %v415_v13 = vmul.f32 %v673_v11, %v635_v7 }
  0xd7   : > { %v371_v12 = vpop.f32.mrf.mxu0  ;;  %v387_v16 = vpop.f32.mrf.mxu1 }
  0xd8   : > { %v426_v14 = vadd.f32 %v636_v9, %v411_v10  ;;  %v409_v15 = vmul.f32 %v635_v7, %v371_v12  ;;  %v430_v17 = vadd.f32 %v636_v9, %v415_v13  ;;  %v413_v19 = vmul.f32 %v635_v7, %v387_v16 }
  0xd9   : > { %v670_v18 = vpop.f32.mrf.mxu0  ;;  %v674_v23 = vpop.f32.mrf.mxu1 }
  0xda   : > { %v651_v20 = vpack.c.bf16 %v426_v14, %v426_v14  ;;  %v424_v21 = vadd.f32 %v636_v9, %v409_v15  ;;  %v412_v22 = vmul.f32 %v670_v18, %v635_v7  ;;  %v655_v24 = vpack.c.bf16 %v430_v17, %v430_v17 }
  0xdb   : > { %v428_v25 = vadd.f32 %v636_v9, %v413_v19  ;;  %v374_v26 = vpop.f32.mrf.mxu0  ;;  %v416_v27 = vmul.f32 %v674_v23, %v635_v7  ;;  %v390_v31 = vpop.f32.mrf.mxu1  ;;  %v478_v44 = vsel %vm474_vm3, %v426_v14, 0.0  ;;  %v486_v52 = vsel %vm474_vm3, %v430_v17, 0.0 }
  0xdc   : > { %467 = vst.msk [vmem:[%s805_s11 + $0x8] sm:$0xf] %vm464_vm2, %v651_v20  ;;  %v649_v28 = vpack.c.bf16 %v424_v21, %v424_v21  ;;  %v427_v29 = vadd.f32 %v636_v9, %v412_v22  ;;  %v410_v30 = vmul.f32 %v635_v7, %v374_v26  ;;  %471 = vst.msk [vmem:[%s805_s11 + $0x18] sm:$0xf] %vm464_vm2, %v655_v24  ;;  %v475_v39 = vsel %vm474_vm3, %v424_v21, 0.0 }
  0xdd   : > { %v653_v32 = vpack.c.bf16 %v428_v25, %v428_v25  ;;  %v431_v33 = vadd.f32 %v636_v9, %v416_v27  ;;  %v414_v34 = vmul.f32 %v635_v7, %v390_v31  ;;  %v482_v48 = vsel %vm474_vm3, %v428_v25, 0.0 }
  0xde   : > { %465 = vst.msk [vmem:[%s805_s11] sm:$0xf] %vm464_vm2, %v649_v28  ;;  %v652_v35 = vpack.c.bf16 %v427_v29, %v427_v29  ;;  %v425_v36 = vadd.f32 %v636_v9, %v410_v30  ;;  %v480_v46 = vsel %vm474_vm3, %v427_v29, 0.0 }
  0xdf   : > { %469 = vst.msk [vmem:[%s805_s11 + $0x10] sm:$0xf] %vm464_vm2, %v653_v32  ;;  %v656_v37 = vpack.c.bf16 %v431_v33, %v431_v33  ;;  %v429_v38 = vadd.f32 %v636_v9, %v414_v34  ;;  %v488_v54 = vsel %vm474_vm3, %v431_v33, 0.0 }
  0xe0   : > { %468 = vst.msk [vmem:[%s805_s11 + $0xc] sm:$0xf] %vm464_vm2, %v652_v35  ;;  %v650_v40 = vpack.c.bf16 %v425_v36, %v425_v36  ;;  %v476_v41 = vsel %vm474_vm3, %v425_v36, 0.0 }
  0xe1   : > { %v477_v42 = vadd.f32 %v476_v41, %v475_v39  ;;  %472 = vst.msk [vmem:[%s805_s11 + $0x1c] sm:$0xf] %vm464_vm2, %v656_v37  ;;  %v654_v43 = vpack.c.bf16 %v429_v38, %v429_v38  ;;  %v484_v50 = vsel %vm474_vm3, %v429_v38, 0.0 }
  0xe2   : > { %466 = vst.msk [vmem:[%s805_s11 + $0x4] sm:$0xf] %vm464_vm2, %v650_v40 }
  0xe3   : > { %v479_v45 = vadd.f32 %v478_v44, %v477_v42  ;;  %470 = vst.msk [vmem:[%s805_s11 + $0x14] sm:$0xf] %vm464_vm2, %v654_v43 }
  0xe5   : > { %v481_v47 = vadd.f32 %v480_v46, %v479_v45 }
  0xe7   : > { %v483_v49 = vadd.f32 %v482_v48, %v481_v47 }
  0xe9   : > { %v485_v51 = vadd.f32 %v484_v50, %v483_v49 }
  0xeb   : > { %v487_v53 = vadd.f32 %v486_v52, %v485_v51 }
  0xed   : > { %v489_v55 = vadd.f32 %v488_v54, %v487_v53 }
  0xef   : > { %v490_v56 = vrot.slane %v489_v55, 4 }
  0xf1   : > { %v491_v57 = vadd.f32 %v490_v56, %v489_v55 }
  0xf3   : > { %v492_v58 = vrot.slane %v491_v57, 2 }
  0xf5   : > { %v493_v59 = vadd.f32 %v492_v58, %v491_v57 }
  0xf7   : > { %v494_v60 = vrot.slane %v493_v59, 1 }
  0xf9   : > { %v495_v62 = vadd.f32 %v494_v60, %v493_v59 }
  0xfb   : > { %v496_v63 = vadd.f32 %v495_v62, %v473_v61 }
  0xfd   : > { %498 = vst.msk [vmem:[#allocation2] sm:$0x1] %vm278_vm1, %v496_v63 }
 0x104   : > { %v502_v0 = vld [vmem:[#allocation2] sm:$0x1] }
 0x105   : > { %503 = vst.msk [vmem:[%s272_s14] sm:$0x1] %vm278_vm1, %v502_v0 }
 0x106 PF: > { %s16_s20 = sadd.s32 1, %s732_s20   ;;  %s852_s18 = smov %s728_s19 }
 0x107   : > { %p13_p5 = scmp.ge.s32.totalorder %s16_s20, 4   ;;  %s853_s19 = smov %s855_s21 }
 0x109   :  { %15 = sbr.rel (!%p13_p5) target bundleno = 2 (0x2), region = 86 }

// kernel: bottleneck_forward.8
= control target key start
LH: loop header
LB: loop body
LE: loop exit
PB: predicated region body
PF: predicated region fallthrough
CT: control target
= control target key end

     0   :  { %v257_v0 = vmov 0.0   ;;  %vm258_vm0 = vmmov 0   ;;  %vm37_vm1 = vcmask 523264   ;;  %vm124_vm2 = vcmask 1043456   ;;  %s328_s1 = inlined_call_operand.vmem [shape: f32[64,4], index: 1, kind: input, shape index: {}]   ;;  %s329_s0 = inlined_call_operand.vmem [shape: f32[2,64], index: 0, kind: input, shape index: {}]   ;;  %s330_s3 = inlined_call_operand.vmem [shape: f32[4,64], index: 3, kind: input, shape index: {}]   ;;  %s331_s2 = inlined_call_operand.vmem [shape: f32[1,4], index: 2, kind: input, shape index: {}]   ;;  %s332_s4 = inlined_call_operand.vmem [shape: f32[1,64], index: 4, kind: input, shape index: {}]   ;;  %s333_s5 = inlined_call_operand.vmem [shape: f32[2,64], index: 5, kind: output, shape index: {}]  }
   0x1   :  { %227 = vmatprep.subr.mxu0 %v257_v0  ;;  %v29_v1 = vld [vmem:[%s328_s1 + $0x38] sm:$0xff]  ;;  %v28_v2 = vld [vmem:[%s328_s1 + $0x30] sm:$0xff]  ;;  %243 = vmatprep.mubr.msk.f32.mxu0 %vm258_vm0, %v257_v0  ;;  %v27_v3 = vld [vmem:[%s328_s1 + $0x28] sm:$0xff]  ;;  %vm120_vm3 = vcmask 31744   ;;  %vm204_vm4 = vcmask 517120  }
   0x2   :  { %228 = vmatpush3.msra.mxu0 %v29_v1  ;;  %246 = vmatprep.subr.mxu1 %v257_v0  ;;  %v26_v4 = vld [vmem:[%s328_s1 + $0x20] sm:$0xff]  ;;  %v25_v5 = vld [vmem:[%s328_s1 + $0x18] sm:$0xff]  ;;  %v24_v6 = vld [vmem:[%s328_s1 + $0x10] sm:$0xff] }
   0x3   :  { %229 = vmatprep.subr.mxu0 %v257_v0  ;;  %248 = vmatprep.mubr.msk.f32.mxu1 %vm258_vm0, %v257_v0  ;;  %v20_v7 = vld [vmem:[%s329_s0] sm:$0x3]  ;;  %v23_v8 = vld [vmem:[%s328_s1 + $0x8] sm:$0xff] }
   0x4   :  { %230 = vmatpush3.msra.mxu0 %v28_v2  ;;  %v22_v9 = vld [vmem:[%s328_s1] sm:$0xff]  ;;  %v21_v10 = vmul.f32 0.015625, %v20_v7 }
   0x5   :  { %231 = vmatprep.subr.mxu0 %v257_v0  ;;  %v112_v11 = vld [vmem:[%s330_s3] sm:$0xf] }
   0x6   :  { %232 = vmatpush3.msra.mxu0 %v27_v3  ;;  %247 = vmatpush3.msk.msra.mxu1 %vm124_vm2, %v112_v11  ;;  %v210_v12 = vld [vmem:[%s331_s2] ss:$0 sm:$0xff] }
   0x7   :  { %233 = vmatprep.subr.mxu0 %v257_v0  ;;  %v212_v17 = vld [vmem:[%s332_s4] ss:$0 sm:$0xff] }
   0x8   :  { %234 = vmatpush3.msra.mxu0 %v26_v4 }
   0x9   :  { %235 = vmatprep.subr.mxu0 %v257_v0 }
   0xa   :  { %236 = vmatpush3.msra.mxu0 %v25_v5 }
   0xb   :  { %237 = vmatprep.subr.mxu0 %v257_v0 }
   0xc   :  { %238 = vmatpush3.msra.mxu0 %v24_v6 }
   0xd   :  { %239 = vmatprep.subr.mxu0 %v257_v0 }
   0xe   :  { %240 = vmatpush3.msra.mxu0 %v23_v8 }
   0xf   :  { %241 = vmatprep.subr.mxu0 %v257_v0 }
  0x10   :  { %242 = vmatpush3.msra.mxu0 %v22_v9 }
  0x11   :  { %244 = vmatmul.mubr.msk.f32.vlgmr.msra.gmra.mxu0 %vm37_vm1, %v21_v10 }
  0xd1   :  { %v107_v13 = vpop.f32.mrf.mxu0 }
  0xd2   :  { %v108_v14 = vadd.f32 %v210_v12, %v107_v13 }
  0xd3   :  { %v245_v15 = vpop.f32.mrf.mxu0 }
  0xd4   :  { %v111_v16 = vmax.f32 %v108_v14, 0.0 }
  0xd6   :  { %249 = vmatmul.mubr.msk.f32.vlgmr.msra.gmra.mxu1 %vm120_vm3, %v111_v16 }
 0x196   :  { %v194_v18 = vpop.f32.mrf.mxu1 }
 0x197   :  { %v195_v19 = vadd.f32 %v212_v17, %v194_v18 }
 0x198   :  { %v250_v20 = vpop.f32.mrf.mxu1 }
 0x199   :  { %v215_v21 = vmul.f32 -1.442695, %v195_v19 }
 0x19b   :  { %253 = vpow2.f32 %v215_v21 }
 0x1a8   :  { %v254_v22 = vpop.eup %253 }
 0x1a9   :  { %v201_v23 = vadd.f32 1.0, %v254_v22 }
 0x1ab   :  { %255 = vrcp.f32 %v201_v23 }
 0x1b8   :  { %v256_v24 = vpop.eup %255 }
 0x1b9   :  { %205 = vst.msk [vmem:[%s333_s5] sm:$0x3] %vm204_vm4, %v256_v24 }

// kernel: bottleneck_forward.6
= control target key start
LH: loop header
LB: loop body
LE: loop exit
PB: predicated region body
PF: predicated region fallthrough
CT: control target
= control target key end

     0   :  { %s2020_s15 = smov 0   ;;  %s2022_s16 = smov 0   ;;  %s2514_s0 = inlined_call_operand.vmem [shape: bf16[2,10,10,32], index: 0, kind: input, shape index: {}]   ;;  %s2515_s1 = inlined_call_operand.vmem [shape: bf16[1,9,32,32], index: 1, kind: input, shape index: {}]   ;;  %s2516_s2 = inlined_call_operand.vmem [shape: f32[1,32], index: 2, kind: input, shape index: {}]   ;;  %s2517_s3 = inlined_call_operand.vmem [shape: f32[1,32], index: 3, kind: input, shape index: {}]   ;;  %s2518_s4 = inlined_call_operand.vmem [shape: bf16[2,8,8,32], index: 4, kind: output, shape index: {}]  }
   0x1   :  { %s2024_s17 = smov 0  }
   0x2 LB: > { %s26_s18 = sadd.s32 1, %s1989_s16  ;;  %p1621_p0 = scmp.ge.s32.totalorder %s1993_s17, 1  ;;  %s1993_s17 = sphi %s2024_s17, %s14_s17   ;;  %s1989_s16 = sphi %s2022_s16, %s2526_s16   ;;  %s1985_s15 = sphi %s2020_s15, %s2525_s15  }
   0x3   : > { %p28_p1 = scmp.ge.s32.totalorder %s26_s18, 2  ;;  %p207_p2 = scmp.lt.s32.totalorder %s1993_s17, 3 }
   0x5   : > { %s2528_s18 = smov (%p28_p1, %s26_s18), 0  ;;  %p208_p3 = pnand %p1621_p0, %p207_p2 }
   0x7   : > { %211 = sbr.rel (%p208_p3) target bundleno = 322 (0x142), region = 36 }
   0xc   : > { %v1944_v0 = vld [vmem:[%s2515_s1 + $0x18] sm:$0xff]   ;;  %p250_p4 = scmp.lt.s32.totalorder %s1985_s15, 1  ;;  %v1945_v1 = vld [vmem:[%s2515_s1 + $0x10] sm:$0xff]   ;;  %v2049_v2 = vld [vmem:[%s2515_s1 + $0x8] sm:$0xff]   ;;  %vm302_vm0 = vsmask.f32 3328 }
   0xd   : > { %1915 = vmatprep.subr.bf16.mxu1 %v1944_v0  ;;  %1807 = vmatprep.subr.bf16.mxu0 %v1944_v0  ;;  %v2055_v3 = vld [vmem:[%s2515_s1 + $0x28] sm:$0xff]   ;;  %vm303_vm1 = vsmask.f32 7440  ;;  %vm446_vm2 = vcmask 261120   ;;  %vm641_vm4 = vcmask 1042432   ;;  %vm642_vm5 = vcmask 1046532  }
   0xe   : > { %s2530_s15 = smov (!%p250_p4, %s1985_s15), 1  ;;  %1917 = vmatpush3.bf16.msra.mxu1 %v1944_v0  ;;  %1808 = vmatpush3.bf16.msra.mxu0 %v1944_v0  ;;  %vm2096_vm3 = vmor %vm302_vm0, %vm303_vm1  ;;  %vm1482_vm7 = vcmask 257024  }
   0xf   : > { %1916 = vmatprep.subr.bf16.mxu1 %v1945_v1  ;;  %1809 = vmatprep.subr.bf16.mxu0 %v1945_v1  ;;  %s1919_s25 = smul.u32 80, %s2530_s15  ;;  %vm2180_vm6 = vmor %vm641_vm4, %vm642_vm5  ;;  %s1752_s19 = sshll.u32 %s2530_s15, 5 }
  0x10   : > { %s2475_s21 = scalar_lea.vmem %s2518_s4, %s1752_s19 }
  0x11   : > { %s2060_s30 = scalar_lea.vmem %s2514_s0, %s1919_s25 }
  0x12   : > { %1918 = vmatpush3.bf16.msra.mxu1 %v1945_v1  ;;  %1810 = vmatpush3.bf16.msra.mxu0 %v1945_v1  ;;  %v2063_v4 = vld [vmem:[%s2060_s30] sm:$0xf]  ;;  %v2066_v5 = vld [vmem:[%s2060_s30 + $0x4] sm:$0x1]  ;;  %v2069_v6 = vld [vmem:[%s2060_s30 + $0x8] sm:$0xf] }
  0x13   : > { %v2072_v7 = vld [vmem:[%s2060_s30 + $0xc] sm:$0x1]  ;;  %v2075_v8 = vld [vmem:[%s2060_s30 + $0x10] sm:$0xf]  ;;  %1819 = vmatprep.subr.bf16.mxu1 %v2049_v2  ;;  %1831 = vmatprep.subr.bf16.mxu0 %v2055_v3  ;;  %v306_v9 = vshrl.u32 %v2063_v4, 16  ;;  %v309_v10 = vshll.u32 %v2063_v4, 16  ;;  %v1639_v53 = vcombine.low %v2063_v4, %v2069_v6 }
  0x14   : > { %v315_v11 = vshll.u32 %v2066_v5, 16  ;;  %v320_v12 = vshrl.u32 %v2069_v6, 16  ;;  %v2084_v13 = vld [vmem:[%s2060_s30 + $0x14] sm:$0x1]  ;;  %v323_v14 = vshll.u32 %v2069_v6, 16  ;;  %v329_v15 = vshll.u32 %v2072_v7, 16 }
  0x15   : > { %v334_v16 = vshrl.u32 %v2075_v8, 16  ;;  %v337_v17 = vshll.u32 %v2075_v8, 16  ;;  %v308_v18 = vrot.slane %v306_v9, 4  ;;  %v311_v19 = vrot.slane %v309_v10, 5  ;;  %v2091_v21 = vld [vmem:[%s2060_s30 + $0x18] sm:$0xf] }
  0x16   : > { %v322_v20 = vrot.slane %v320_v12, 4  ;;  %v325_v22 = vrot.slane %v323_v14, 5  ;;  %v317_v26 = vrot.slane %v315_v11, 5  ;;  %v343_v27 = vshll.u32 %v2084_v13, 16  ;;  %v2101_v32 = vld [vmem:[%s2060_s30 + $0x1c] sm:$0x1] }
  0x17   : > { %v336_v23 = vrot.slane %v334_v16, 4  ;;  %v339_v24 = vrot.slane %v337_v17, 5  ;;  %v312_v25 = vor.u32 %v311_v19, %v308_v18  ;;  %v331_v30 = vrot.slane %v329_v15, 5  ;;  %v2104_v33 = vld [vmem:[%s2060_s30 + $0x20] sm:$0xf] }
  0x18   : > { %v326_v29 = vor.u32 %v325_v22, %v322_v20  ;;  %v348_v34 = vshrl.u32 %v2091_v21, 16  ;;  %v345_v36 = vrot.slane %v343_v27, 5  ;;  %v2108_v37 = vld [vmem:[%s2060_s30 + $0x24] sm:$0x1]  ;;  %v2111_v38 = vld [vmem:[%s2060_s30 + $0x28] sm:$0xf] }
  0x19   : > { %v340_v31 = vor.u32 %v339_v24, %v336_v23  ;;  %v313_v35 = vrot.slane %v312_v25, 4  ;;  %v2114_v41 = vld [vmem:[%s2060_s30 + $0x2c] sm:$0x1]  ;;  %v2117_v42 = vld [vmem:[%s2060_s30 + $0x30] sm:$0xf]  ;;  %v351_v44 = vshll.u32 %v2091_v21, 16 }
  0x1a   : > { %v327_v39 = vrot.slane %v326_v29, 4  ;;  %v350_v43 = vrot.slane %v348_v34, 4  ;;  %v2123_v46 = vld [vmem:[%s2060_s30 + $0x34] sm:$0x1]  ;;  %v357_v47 = vshll.u32 %v2101_v32, 16  ;;  %v362_v48 = vshrl.u32 %v2104_v33, 16 }
  0x1b   : > { %v341_v40 = vrot.slane %v340_v31, 4  ;;  %v318_v45 = vsel %vm2096_vm3, %v313_v35, %v317_v26  ;;  %v365_v49 = vshll.u32 %v2104_v33, 16  ;;  %v646_v51 = vrot.slane %v2066_v5, 5  ;;  %v2141_v56 = vld [vmem:[%s2060_s30 + $0x38] sm:$0xf]  ;;  %v1949_v35 = vld [vmem:[%s2515_s1 + $0x20] sm:$0xff]  }
  0x1c   : > { %v2130_v50 = vsel %vm2096_vm3, %v327_v39, %v331_v30  ;;  %v353_v52 = vrot.slane %v351_v44, 5  ;;  %v364_v57 = vrot.slane %v362_v48, 4  ;;  %v371_v58 = vshll.u32 %v2108_v37, 16  ;;  %v2145_v59 = vld [vmem:[%s2060_s30 + $0x3c] sm:$0x1] }
  0x1d   : > { %v2137_v54 = vsel %vm2096_vm3, %v341_v40, %v345_v36  ;;  %v1629_v55 = vcombine.low %v318_v45, %v2130_v50  ;;  %v359_v61 = vrot.slane %v357_v47, 5  ;;  %v367_v62 = vrot.slane %v365_v49, 5 }
  0x1e   : > { %v354_v60 = vor.u32 %v353_v52, %v350_v43  ;;  %v376_v63 = vshrl.u32 %v2111_v38, 16  ;;  %v379_v0 = vshll.u32 %v2111_v38, 16  ;;  %v385_v1 = vshll.u32 %v2114_v41, 16 }
  0x1f   : > { %1811 = vmatprep.mubr.msk.bf16.mxu0 %vm446_vm2, %v1629_v55  ;;  %v390_v5 = vshrl.u32 %v2117_v42, 16  ;;  %v393_v9 = vshll.u32 %v2117_v42, 16  ;;  %v368_v11 = vor.u32 %v367_v62, %v364_v57  ;;  %v399_v14 = vshll.u32 %v2123_v46, 16 }
  0x20   : > { %v355_v10 = vrot.slane %v354_v60, 4  ;;  %v378_v12 = vrot.slane %v376_v63, 4  ;;  %v373_v15 = vrot.slane %v371_v58, 5  ;;  %v381_v16 = vrot.slane %v379_v0, 5 }
  0x21   : > { %v392_v17 = vrot.slane %v390_v5, 4  ;;  %v395_v18 = vrot.slane %v393_v9, 5  ;;  %v369_v20 = vrot.slane %v368_v11, 4  ;;  %v387_v22 = vrot.slane %v385_v1, 5  ;;  %v1948_v9 = vld [vmem:[%s2515_s1] sm:$0xff]  }
  0x22   : > { %v2156_v19 = vsel %vm2096_vm3, %v355_v10, %v359_v61  ;;  %v404_v23 = vshrl.u32 %v2141_v56, 16  ;;  %v382_v24 = vor.u32 %v381_v16, %v378_v12  ;;  %v407_v26 = vshll.u32 %v2141_v56, 16  ;;  %v2249_v16 = vld [vmem:[%s2060_s30 + $0x40] sm:$0xf] }
  0x23   : > { %v396_v25 = vor.u32 %v395_v18, %v392_v17  ;;  %v413_v27 = vshll.u32 %v2145_v59, 16  ;;  %v650_v29 = vrot.slane %v2072_v7, 5  ;;  %v401_v30 = vrot.slane %v399_v14, 5 }
  0x24   : > { %v406_v31 = vrot.slane %v404_v23, 4  ;;  %v2164_v34 = vcombine.low %v2137_v54, %v2156_v19  ;;  %v2171_v36 = vsel %vm2096_vm3, %v369_v20, %v373_v15  ;;  %v383_v39 = vrot.slane %v382_v24, 4  ;;  %v1957_v23 = vld [vmem:[%s2515_s1 + $0x40] sm:$0xff]  }
  0x25   : > { %v397_v40 = vrot.slane %v396_v25, 4  ;;  %v409_v43 = vrot.slane %v407_v26, 5  ;;  %v654_v44 = vrot.slane %v2084_v13, 5  ;;  %v415_v7 = vrot.slane %v413_v27, 5  ;;  %v2293_v27 = vld [vmem:[%s2060_s30 + $0x48] sm:$0xf] }
  0x26   : > { %v658_v45 = vrot.slane %v2101_v32, 5  ;;  %v662_v47 = vrot.slane %v2108_v37, 5  ;;  %1812 = vmatmul.mubr.msk.bf16.vlgmr.msra.gmra.mxu0 %vm446_vm2, %v2164_v34  ;;  %v2186_v49 = vsel %vm2096_vm3, %v383_v39, %v387_v22  ;;  %v666_v13 = vrot.slane %v2114_v41, 5  ;;  %v1953_v37 = vld [vmem:[%s2515_s1 + $0x48] sm:$0xff]  }
  0x27   : > { %v410_v52 = vor.u32 %v409_v43, %v406_v31  ;;  %1832 = vmatpush3.bf16.msra.mxu0 %v2055_v3  ;;  %v1649_v32 = vrot.slane %v2063_v4, 9  ;;  %v2196_v55 = vsel %vm2096_vm3, %v397_v40, %v401_v30  ;;  %v2200_v57 = vcombine.low %v2171_v36, %v2186_v49  ;;  %v2285_v4 = vld [vmem:[%s2060_s30 + $0x4c] sm:$0x1] }
  0x28   : > { %1833 = vmatprep.subr.bf16.mxu0 %v1949_v35  ;;  %v1650_v58 = vrot.slane %v2069_v6, 9  ;;  %v1651_v41 = vrot.slane %v2075_v8, 9  ;;  %v1652_v61 = vrot.slane %v2091_v21, 9  ;;  %v1653_v62 = vrot.slane %v2104_v33, 9 }
  0x29   : > { %v411_v3 = vrot.slane %v410_v52, 4  ;;  %v647_v60 = vsel %vm2180_vm6, %v1649_v32, %v646_v51  ;;  %1815 = vmatprep.mubr.msk.bf16.mxu1 %vm446_vm2, %v2200_v57  ;;  %v670_v63 = vrot.slane %v2123_v46, 5  ;;  %v1654_v51 = vrot.slane %v2111_v38, 9 }
  0x2a   : > { %v2213_v0 = vsel %vm2180_vm6, %v1650_v58, %v650_v29  ;;  %v2217_v1 = vsel %vm2180_vm6, %v1651_v41, %v654_v44  ;;  %v2230_v10 = vsel %vm2180_vm6, %v1652_v61, %v658_v45  ;;  %v2234_v11 = vsel %vm2180_vm6, %v1653_v62, %v662_v47  ;;  %v1955_v45 = vld [vmem:[%s2515_s1 + $0x30] sm:$0xff]   ;;  %v2312_v47 = vld [vmem:[%s2060_s30 + $0x44] sm:$0x1]  ;;  %v1959_v58 = vld [vmem:[%s2515_s1 + $0x58] sm:$0xff]  }
  0x2b   : > { %v2222_v5 = vsel %vm2096_vm3, %v411_v3, %v415_v7  ;;  %1834 = vmatpush3.bf16.msra.mxu0 %v1949_v35  ;;  %v1661_v46 = vcombine.low %v647_v60, %v2213_v0  ;;  %v2242_v14 = vcombine.low %v2217_v1, %v2230_v10  ;;  %v2246_v15 = vsel %vm2180_vm6, %v1654_v51, %v666_v13 }
  0x2c   : > { %v2238_v12 = vcombine.low %v2196_v55, %v2222_v5  ;;  %1855 = vmatprep.subr.bf16.mxu0 %v1953_v37  ;;  %v2254_v17 = vcombine.low %v2234_v11, %v2246_v15  ;;  %v1655_v18 = vrot.slane %v2117_v42, 9  ;;  %v1656_v20 = vrot.slane %v2141_v56, 9 }
  0x2d   : > { %1835 = vmatprep.mubr.msk.bf16.mxu0 %vm446_vm2, %v1661_v46  ;;  %v674_v22 = vrot.slane %v2145_v59, 5  ;;  %v899_v25 = vshrl.u32 %v2249_v16, 16  ;;  %v902_v26 = vshll.u32 %v2249_v16, 16  ;;  %v1640_v29 = vcombine.low %v2075_v8, %v2091_v21  ;;  %v1963_v46 = vld [vmem:[%s2515_s1 + $0x50] sm:$0xff]  }
  0x2e   : > { %1816 = vmatmul.mubr.msk.bf16.vlgmr.msra.gmra.mxu1 %vm446_vm2, %v2238_v12  ;;  %1836 = vmatmul.mubr.msk.bf16.vlgmr.msra.gmra.mxu0 %vm446_vm2, %v2242_v14  ;;  %v2273_v59 = vsel %vm2180_vm6, %v1655_v18, %v670_v63  ;;  %v1228_v31 = vshrl.u32 %v2293_v27, 16  ;;  %v1231_v35 = vshll.u32 %v2293_v27, 16  ;;  %v1641_v39 = vcombine.low %v2104_v33, %v2111_v38 }
  0x2f   : > { %1820 = vmatpush3.bf16.msra.mxu1 %v2049_v2  ;;  %1823 = vmatprep.mubr.msk.bf16.mxu1 %vm446_vm2, %v1639_v53  ;;  %v2277_v24 = vsel %vm2180_vm6, %v1656_v20, %v674_v22  ;;  %v1951_v2 = vld [vmem:[%s2515_s1 + $0x38] sm:$0xff]   ;;  %v1961_v53 = vld [vmem:[%s2515_s1 + $0x68] sm:$0xff]   ;;  %v901_v40 = vrot.slane %v899_v25, 4  ;;  %v904_v43 = vrot.slane %v902_v26, 5  ;;  %v1237_v44 = vshll.u32 %v2285_v4, 16  ;;  %v1968_v20 = vld [vmem:[%s2515_s1 + $0x70] sm:$0xff]  }
  0x30   : > { %1821 = vmatprep.subr.bf16.mxu1 %v1948_v9  ;;  %1856 = vmatpush3.bf16.msra.mxu0 %v1953_v37  ;;  %v2299_v30 = vcombine.low %v2273_v59, %v2277_v24  ;;  %v1689_v7 = vcombine.low %v2130_v50, %v2137_v54  ;;  %v1230_v52 = vrot.slane %v1228_v31, 4  ;;  %v1233_v13 = vrot.slane %v1231_v35, 5 }
  0x31   : > { %1839 = vmatprep.mubr.msk.bf16.mxu0 %vm446_vm2, %v2254_v17  ;;  %1857 = vmatprep.subr.bf16.mxu0 %v1957_v23  ;;  %v2317_v37 = vrot.slane %v1237_v44, 5  ;;  %v905_v50 = vor.u32 %v904_v43, %v901_v40  ;;  %v908_v54 = vshll.u32 %v2312_v47, 16  ;;  %v1690_v3 = vcombine.low %v2156_v19, %v2171_v36  ;;  %v1965_v19 = vld [vmem:[%s2515_s1 + $0x60] sm:$0xff]  }
  0x32   : > { %v1234_v32 = vor.u32 %v1233_v13, %v1230_v52  ;;  %v1642_v60 = vcombine.low %v2117_v42, %v2141_v56  ;;  %v1675_v62 = vcombine.low %v2069_v6, %v2075_v8  ;;  %v1967_v8 = vld [vmem:[%s2515_s1 + $0x88] sm:$0xff]   ;;  %v1676_v36 = vcombine.low %v2091_v21, %v2104_v33  ;;  %v1966_v21 = vld [vmem:[%s2515_s1 + $0x78] sm:$0xff]  }
  0x33   : > { %1822 = vmatpush3.bf16.msra.mxu1 %v1948_v9  ;;  %v906_v63 = vrot.slane %v905_v50, 4  ;;  %v910_v51 = vrot.slane %v908_v54, 5  ;;  %v1691_v9 = vcombine.low %v2186_v49, %v2196_v55  ;;  %v1677_v55 = vcombine.low %v2111_v38, %v2117_v42  ;;  %v1970_v42 = vld [vmem:[%s2515_s1 + $0x80] sm:$0xff]  }
  0x34   : > { %1843 = vmatprep.subr.bf16.mxu1 %v1951_v2  ;;  %1858 = vmatpush3.bf16.msra.mxu0 %v1957_v23  ;;  %v2325_v41 = vrot.slane %v1234_v32, 4  ;;  %v1678_v33 = vcombine.low %v2141_v56, %v2249_v16  ;;  %v1704_v38 = vcombine.low %v2213_v0, %v2217_v1  ;;  %v1705_v56 = vcombine.low %v2230_v10, %v2234_v11 }
  0x35   : > { %1879 = vmatprep.subr.bf16.mxu0 %v1961_v53  ;;  %v911_v6 = vsel %vm2096_vm3, %v906_v63, %v910_v51  ;;  %v1718_v0 = vcombine.low %v2249_v16, %v2293_v27  ;;  %v1706_v1 = vcombine.low %v2246_v15, %v2273_v59  ;;  %v1022_v18 = vrot.slane %v2312_v47, 5 }
  0x36   : > { %1824 = vmatmul.mubr.msk.bf16.vlgmr.msra.gmra.mxu1 %vm446_vm2, %v1640_v29  ;;  %1840 = vmatmul.mubr.msk.bf16.gmra.mxu0 %vm446_vm2, %v2299_v30  ;;  %v1240_v61 = vsel %vm2096_vm3, %v2325_v41, %v2317_v37  ;;  %v1692_v49 = vcombine.low %v2222_v5, %v911_v6  ;;  %v1699_v5 = vrot.slane %v2249_v16, 9  ;;  %v1736_v15 = vrot.slane %v2293_v27, 9 }
  0x37   : > { %1844 = vmatpush3.bf16.msra.mxu1 %v1951_v2  ;;  %1827 = vmatprep.mubr.msk.bf16.mxu1 %vm446_vm2, %v1641_v39  ;;  %v1339_v16 = vrot.slane %v2285_v4, 5 }
  0x38   : > { %1845 = vmatprep.subr.bf16.mxu1 %v1955_v45  ;;  %1859 = vmatprep.mubr.msk.bf16.mxu0 %vm446_vm2, %v1689_v7  ;;  %v1023_v10 = vsel %vm2180_vm6, %v1699_v5, %v1022_v18 }
  0x39   : > { %v1707_v11 = vcombine.low %v2277_v24, %v1023_v10 }
  0x3b   : > { %1846 = vmatpush3.bf16.msra.mxu1 %v1955_v45 }
  0x3c   : > { %1867 = vmatprep.subr.bf16.mxu1 %v1959_v58 }
  0x3e   : > { %1828 = vmatmul.mubr.msk.bf16.gmra.mxu1 %vm446_vm2, %v1642_v60  ;;  %1860 = vmatmul.mubr.msk.bf16.vlgmr.msra.gmra.mxu0 %vm446_vm2, %v1690_v3 }
  0x3f   : > { %1847 = vmatprep.mubr.msk.bf16.mxu1 %vm446_vm2, %v1675_v62  ;;  %1880 = vmatpush3.bf16.msra.mxu0 %v1961_v53 }
  0x40   : > { %1863 = vmatprep.mubr.msk.bf16.mxu0 %vm446_vm2, %v1691_v9  ;;  %1881 = vmatprep.subr.bf16.mxu0 %v1965_v19 }
  0x43   : > { %1882 = vmatpush3.bf16.msra.mxu0 %v1965_v19 }
  0x44   : > { %1903 = vmatprep.subr.bf16.mxu0 %v1967_v8 }
  0x46   : > { %1848 = vmatmul.mubr.msk.bf16.vlgmr.msra.gmra.mxu1 %vm446_vm2, %v1676_v36  ;;  %1864 = vmatmul.mubr.msk.bf16.gmra.mxu0 %vm446_vm2, %v1692_v49 }
  0x47   : > { %1868 = vmatpush3.bf16.msra.mxu1 %v1959_v58  ;;  %1851 = vmatprep.mubr.msk.bf16.mxu1 %vm446_vm2, %v1677_v55 }
  0x48   : > { %1869 = vmatprep.subr.bf16.mxu1 %v1963_v46  ;;  %1883 = vmatprep.mubr.msk.bf16.mxu0 %vm446_vm2, %v1640_v29 }
  0x4b   : > { %1870 = vmatpush3.bf16.msra.mxu1 %v1963_v46 }
  0x4c   : > { %1891 = vmatprep.subr.bf16.mxu1 %v1966_v21 }
  0x4e   : > { %1852 = vmatmul.mubr.msk.bf16.gmra.mxu1 %vm446_vm2, %v1678_v33  ;;  %1884 = vmatmul.mubr.msk.bf16.vlgmr.msra.gmra.mxu0 %vm446_vm2, %v1641_v39 }
  0x4f   : > { %1871 = vmatprep.mubr.msk.bf16.mxu1 %vm446_vm2, %v1704_v38  ;;  %1904 = vmatpush3.bf16.msra.mxu0 %v1967_v8 }
  0x50   : > { %1887 = vmatprep.mubr.msk.bf16.mxu0 %vm446_vm2, %v1642_v60  ;;  %1905 = vmatprep.subr.bf16.mxu0 %v1970_v42 }
  0x53   : > { %1906 = vmatpush3.bf16.msra.mxu0 %v1970_v42 }
  0x56   : > { %1872 = vmatmul.mubr.msk.bf16.vlgmr.msra.gmra.mxu1 %vm446_vm2, %v1705_v56  ;;  %1888 = vmatmul.mubr.msk.bf16.gmra.mxu0 %vm446_vm2, %v1718_v0 }
  0x57   : > { %1892 = vmatpush3.bf16.msra.mxu1 %v1966_v21  ;;  %1875 = vmatprep.mubr.msk.bf16.mxu1 %vm446_vm2, %v1706_v1 }
  0x58   : > { %1893 = vmatprep.subr.bf16.mxu1 %v1968_v20  ;;  %1907 = vmatprep.mubr.msk.bf16.mxu0 %vm446_vm2, %v2242_v14  ;;  %v1340_v14 = vsel %vm2180_vm6, %v1736_v15, %v1339_v16 }
  0x59   : > { %v1741_v22 = vcombine.low %v1023_v10, %v1340_v14 }
  0x5b   : > { %1894 = vmatpush3.bf16.msra.mxu1 %v1968_v20 }
  0x5e   : > { %1876 = vmatmul.mubr.msk.bf16.gmra.mxu1 %vm446_vm2, %v1707_v11  ;;  %1908 = vmatmul.mubr.msk.bf16.vlgmr.msra.gmra.mxu0 %vm446_vm2, %v2254_v17 }
  0x5f   : > { %1895 = vmatprep.mubr.msk.bf16.mxu1 %vm446_vm2, %v2164_v34  ;;  %1911 = vmatprep.mubr.msk.bf16.mxu0 %vm446_vm2, %v2299_v30  ;;  %v1729_v34 = vcombine.low %v911_v6, %v1240_v61 }
  0x66   : > { %1896 = vmatmul.mubr.msk.bf16.vlgmr.msra.gmra.mxu1 %vm446_vm2, %v2200_v57  ;;  %1912 = vmatmul.mubr.msk.bf16.gmra.mxu0 %vm446_vm2, %v1741_v22 }
  0x67   : > { %1899 = vmatprep.mubr.msk.bf16.mxu1 %vm446_vm2, %v2238_v12 }
  0x6e   : > { %1900 = vmatmul.mubr.msk.bf16.gmra.mxu1 %vm446_vm2, %v1729_v34 }
  0xe6   : > { %v1813_v17 = vpop.f32.mrf.mxu0 }
  0xe8   : > { %v493_v48 = vpop.f32.mrf.mxu0 }
  0xea   : > { %v1814_v23 = vpop.f32.mrf.mxu0 }
  0xec   : > { %v496_v59 = vpop.f32.mrf.mxu0 }
  0xee   : > { %v1817_v24 = vpop.f32.mrf.mxu1  ;;  %v1837_v25 = vpop.f32.mrf.mxu0 }
  0xf0   : > { %v509_v57 = vpop.f32.mrf.mxu1  ;;  %v751_v26 = vpop.f32.mrf.mxu0 }
  0xf2   : > { %v1818_v2 = vpop.f32.mrf.mxu1  ;;  %v1838_v4 = vpop.f32.mrf.mxu0 }
  0xf4   : > { %v2418_v53 = vpop.f32.mrf.mxu1  ;;  %v754_v12 = vpop.f32.mrf.mxu0 }
  0xf6   : > { %v1825_v28 = vpop.f32.mrf.mxu1  ;;  %v1841_v27 = vpop.f32.mrf.mxu0 }
  0xf7   : > { %v611_v49 = vadd.f32 %v1825_v28, %v1813_v17 }
  0xf8   : > { %v602_v29 = vpop.f32.mrf.mxu1  ;;  %v2420_v30 = vpop.f32.mrf.mxu0 }
  0xf9   : > { %v603_v21 = vadd.f32 %v602_v29, %v493_v48  ;;  %v784_v42 = vadd.f32 %v1837_v25, %v611_v49 }
  0xfa   : > { %v1826_v31 = vpop.f32.mrf.mxu1  ;;  %v2422_v35 = vpop.f32.mrf.mxu0 }
  0xfb   : > { %v614_v56 = vadd.f32 %v1826_v31, %v1814_v23  ;;  %v782_v5 = vadd.f32 %v751_v26, %v603_v21 }
  0xfc   : > { %v605_v39 = vpop.f32.mrf.mxu1  ;;  %v2424_v40 = vpop.f32.mrf.mxu0 }
  0xfd   : > { %v606_v18 = vadd.f32 %v605_v39, %v496_v59  ;;  %v785_v15 = vadd.f32 %v1838_v4, %v614_v56 }
  0xfe   : > { %v1829_v43 = vpop.f32.mrf.mxu1  ;;  %v1861_v44 = vpop.f32.mrf.mxu0 }
  0xff   : > { %v627_v14 = vadd.f32 %v1829_v43, %v1817_v24  ;;  %v783_v17 = vadd.f32 %v754_v12, %v606_v18 }
 0x100   : > { %v618_v7 = vpop.f32.mrf.mxu1  ;;  %v980_v45 = vpop.f32.mrf.mxu0 }
 0x101   : > { %v619_v29 = vadd.f32 %v618_v7, %v509_v57  ;;  %v788_v59 = vadd.f32 %v1841_v27, %v627_v14 }
 0x102   : > { %v1830_v47 = vpop.f32.mrf.mxu1  ;;  %v1862_v52 = vpop.f32.mrf.mxu0 }
 0x103   : > { %v630_v25 = vadd.f32 %v1830_v47, %v1818_v2  ;;  %v786_v24 = vadd.f32 %v2420_v30, %v619_v29  ;;  %v2452_v30 = vld [vmem:[%s2516_s2] ss:$0 sm:$0xff] }
 0x104   : > { %v621_v13 = vpop.f32.mrf.mxu1  ;;  %v983_v32 = vpop.f32.mrf.mxu0 }
 0x105   : > { %v622_v39 = vadd.f32 %v621_v13, %v2418_v53  ;;  %v789_v12 = vadd.f32 %v2422_v35, %v630_v25 }
 0x106   : > { %v1849_v37 = vpop.f32.mrf.mxu1  ;;  %v2426_v50 = vpop.f32.mrf.mxu0 }
 0x107   : > { %v892_v20 = vadd.f32 %v1849_v37, %v784_v42 }
 0x108   : > { %v859_v54 = vpop.f32.mrf.mxu1  ;;  %v2428_v58 = vpop.f32.mrf.mxu0 }
 0x109   : > { %v890_v16 = vadd.f32 %v859_v54, %v782_v5  ;;  %v1013_v48 = vadd.f32 %v1861_v44, %v892_v20 }
 0x10a   : > { %v1850_v41 = vpop.f32.mrf.mxu1  ;;  %v2430_v3 = vpop.f32.mrf.mxu0 }
 0x10b   : > { %v893_v28 = vadd.f32 %v1850_v41, %v785_v15  ;;  %v1011_v49 = vadd.f32 %v980_v45, %v890_v16  ;;  %v787_v45 = vadd.f32 %v2424_v40, %v622_v39 }
 0x10c   : > { %v862_v60 = vpop.f32.mrf.mxu1  ;;  %v2432_v61 = vpop.f32.mrf.mxu0 }
 0x10d   : > { %v1014_v4 = vadd.f32 %v1862_v52, %v893_v28 }
 0x10e   : > { %v1853_v62 = vpop.f32.mrf.mxu1  ;;  %v1885_v63 = vpop.f32.mrf.mxu0 }
 0x10f   : > { %v896_v43 = vadd.f32 %v1853_v62, %v788_v59 }
 0x110   : > { %v875_v51 = vpop.f32.mrf.mxu1  ;;  %v1188_v9 = vpop.f32.mrf.mxu0 }
 0x111   : > { %v894_v47 = vadd.f32 %v875_v51, %v786_v24  ;;  %v1017_v52 = vadd.f32 %v2426_v50, %v896_v43  ;;  %v2459_v50 = vld [vmem:[%s2517_s3] ss:$0 sm:$0xff] }
 0x112   : > { %v1854_v19 = vpop.f32.mrf.mxu1  ;;  %v1886_v6 = vpop.f32.mrf.mxu0 }
 0x113   : > { %v897_v41 = vadd.f32 %v1854_v19, %v789_v12 }
 0x114   : > { %v878_v8 = vpop.f32.mrf.mxu1  ;;  %v2434_v36 = vpop.f32.mrf.mxu0 }
 0x115   : > { %v1018_v51 = vadd.f32 %v2430_v3, %v897_v41 }
 0x116   : > { %v1873_v55 = vpop.f32.mrf.mxu1  ;;  %v2436_v46 = vpop.f32.mrf.mxu0 }
 0x117   : > { %v1125_v26 = vadd.f32 %v1873_v55, %v1013_v48 }
 0x118   : > { %v1092_v33 = vpop.f32.mrf.mxu1  ;;  %v2438_v38 = vpop.f32.mrf.mxu0 }
 0x119   : > { %v1123_v54 = vadd.f32 %v1092_v33, %v1011_v49  ;;  %v1221_v2 = vadd.f32 %v1885_v63, %v1125_v26  ;;  %v895_v33 = vadd.f32 %v878_v8, %v787_v45  ;;  %v1015_v63 = vadd.f32 %v2428_v58, %v894_v47 }
 0x11a   : > { %v1874_v0 = vpop.f32.mrf.mxu1  ;;  %v2440_v1 = vpop.f32.mrf.mxu0 }
 0x11b   : > { %2523 = vst [vmem:[#allocation2_spill] sm:$0xff] %v2440_v1  ;;  %v891_v1 = vadd.f32 %v862_v60, %v783_v17  ;;  %v1126_v7 = vadd.f32 %v1874_v0, %v1014_v4  ;;  %v1219_v53 = vadd.f32 %v1188_v9, %v1123_v54 }
 0x11c   : > { %v1095_v10 = vpop.f32.mrf.mxu1  ;;  %v2442_v11 = vpop.f32.mrf.mxu0 }
 0x11d   : > { %v1012_v57 = vadd.f32 %v983_v32, %v891_v1  ;;  %v1222_v32 = vadd.f32 %v1886_v6, %v1126_v7  ;;  %v1016_v1 = vadd.f32 %v2432_v61, %v895_v33 }
 0x11e   : > { %v1877_v22 = vpop.f32.mrf.mxu1  ;;  %v1909_v34 = vpop.f32.mrf.mxu0 }
 0x11f   : > { %v1124_v13 = vadd.f32 %v1095_v10, %v1012_v57  ;;  %v1129_v9 = vadd.f32 %v1877_v22, %v1017_v52 }
 0x120   : > { %v1108_v23 = vpop.f32.mrf.mxu1  ;;  %v1397_v31 = vpop.f32.mrf.mxu0 }
 0x121   : > { %v1220_v42 = vadd.f32 %v2434_v36, %v1124_v13  ;;  %v1127_v5 = vadd.f32 %v1108_v23, %v1015_v63  ;;  %v1225_v16 = vadd.f32 %v2436_v46, %v1129_v9 }
 0x122   : > { %v1878_v37 = vpop.f32.mrf.mxu1  ;;  %v1910_v21 = vpop.f32.mrf.mxu0  ;;  %v2524_v29 = vld [vmem:[#allocation2_spill] sm:$0xff] }
 0x123   : > { %v1130_v58 = vadd.f32 %v1878_v37, %v1018_v51  ;;  %v1223_v28 = vadd.f32 %v2438_v38, %v1127_v5 }
 0x124   : > { %v1111_v44 = vpop.f32.mrf.mxu1  ;;  %v1400_v60 = vpop.f32.mrf.mxu0 }
 0x125   : > { %v1128_v14 = vadd.f32 %v1111_v44, %v1016_v1  ;;  %v1226_v25 = vadd.f32 %v2524_v29, %v1130_v58 }
 0x126   : > { %v1897_v27 = vpop.f32.mrf.mxu1  ;;  %v1913_v8 = vpop.f32.mrf.mxu0 }
 0x127   : > { %v1330_v55 = vadd.f32 %v1897_v27, %v1221_v2  ;;  %v1224_v38 = vadd.f32 %v2442_v11, %v1128_v14 }
 0x128   : > { %v1297_v35 = vpop.f32.mrf.mxu1  ;;  %v1413_v22 = vpop.f32.mrf.mxu0 }
 0x129   : > { %v1430_v62 = vadd.f32 %v1909_v34, %v1330_v55  ;;  %v1328_v40 = vadd.f32 %v1297_v35, %v1219_v53 }
 0x12a   : > { %v1898_v19 = vpop.f32.mrf.mxu1  ;;  %v1914_v4 = vpop.f32.mrf.mxu0 }
 0x12b   : > { %v1445_v56 = vmul.f32 %v2452_v30, %v1430_v62  ;;  %v1428_v6 = vadd.f32 %v1397_v31, %v1328_v40  ;;  %v1331_v0 = vadd.f32 %v1898_v19, %v1222_v32 }
 0x12c   : > { %v1300_v18 = vpop.f32.mrf.mxu1 }
 0x12d   : > { %v1460_v3 = vadd.f32 %v2459_v50, %v1445_v56  ;;  %v1443_v20 = vmul.f32 %v2452_v30, %v1428_v6  ;;  %v1431_v10 = vadd.f32 %v1910_v21, %v1331_v0  ;;  %v1329_v15 = vadd.f32 %v1300_v18, %v1220_v42 }
 0x12e   : > { %v1901_v36 = vpop.f32.mrf.mxu1 }
 0x12f   : > { %v1468_v34 = vmax.f32 %v1460_v3, 0.0  ;;  %v1458_v17 = vadd.f32 %v2459_v50, %v1443_v20  ;;  %v1446_v61 = vmul.f32 %v2452_v30, %v1431_v10  ;;  %v1429_v48 = vadd.f32 %v1400_v60, %v1329_v15  ;;  %v1416_v60 = vpop.f32.mrf.mxu0 }
 0x130   : > { %v1334_v46 = vadd.f32 %v1901_v36, %v1225_v16  ;;  %v1313_v23 = vpop.f32.mrf.mxu1 }
 0x131   : > { %v1476_v31 = vpack.c.bf16 %v1468_v34, %v1468_v34  ;;  %v1466_v49 = vmax.f32 %v1458_v17, 0.0  ;;  %v1461_v26 = vadd.f32 %v2459_v50, %v1446_v61  ;;  %v1444_v59 = vmul.f32 %v2452_v30, %v1429_v48 }
 0x132   : > { %v1434_v39 = vadd.f32 %v1913_v8, %v1334_v46  ;;  %v1332_v37 = vadd.f32 %v1313_v23, %v1223_v28  ;;  %v1902_v21 = vpop.f32.mrf.mxu1 }
 0x133   : > { %1485 = vst.msk [vmem:[%s2475_s21 + $0x8] sm:$0xf] %vm1482_vm7, %v1476_v31  ;;  %v1474_v54 = vpack.c.bf16 %v1466_v49, %v1466_v49  ;;  %v1469_v24 = vmax.f32 %v1461_v26, 0.0  ;;  %v1459_v12 = vadd.f32 %v2459_v50, %v1444_v59  ;;  %v1335_v43 = vadd.f32 %v1902_v21, %v1226_v25 }
 0x134   : > { %v1449_v44 = vmul.f32 %v2452_v30, %v1434_v39  ;;  %v1432_v57 = vadd.f32 %v1413_v22, %v1332_v37  ;;  %v1316_v2 = vpop.f32.mrf.mxu1 }
 0x135   : > { %1483 = vst.msk [vmem:[%s2475_s21] sm:$0xf] %vm1482_vm7, %v1474_v54  ;;  %v1477_v11 = vpack.c.bf16 %v1469_v24, %v1469_v24  ;;  %v1467_v7 = vmax.f32 %v1459_v12, 0.0  ;;  %v1435_v45 = vadd.f32 %v1914_v4, %v1335_v43  ;;  %v1333_v47 = vadd.f32 %v1316_v2, %v1224_v38 }
 0x136   : > { %v1464_v41 = vadd.f32 %v2459_v50, %v1449_v44  ;;  %v1447_v27 = vmul.f32 %v2452_v30, %v1432_v57 }
 0x137   : > { %1486 = vst.msk [vmem:[%s2475_s21 + $0xc] sm:$0xf] %vm1482_vm7, %v1477_v11  ;;  %v1475_v53 = vpack.c.bf16 %v1467_v7, %v1467_v7  ;;  %v1450_v13 = vmul.f32 %v2452_v30, %v1435_v45  ;;  %v1433_v55 = vadd.f32 %v1416_v60, %v1333_v47 }
 0x138   : > { %v1472_v52 = vmax.f32 %v1464_v41, 0.0  ;;  %v1462_v33 = vadd.f32 %v2459_v50, %v1447_v27 }
 0x139   : > { %1484 = vst.msk [vmem:[%s2475_s21 + $0x4] sm:$0xf] %vm1482_vm7, %v1475_v53  ;;  %v1465_v35 = vadd.f32 %v2459_v50, %v1450_v13  ;;  %v1448_v32 = vmul.f32 %v2452_v30, %v1433_v55 }
 0x13a   : > { %v1480_v62 = vpack.c.bf16 %v1472_v52, %v1472_v52  ;;  %v1470_v40 = vmax.f32 %v1462_v33, 0.0 }
 0x13b   : > { %v1473_v63 = vmax.f32 %v1465_v35, 0.0  ;;  %v1463_v51 = vadd.f32 %v2459_v50, %v1448_v32 }
 0x13c   : > { %1489 = vst.msk [vmem:[%s2475_s21 + $0x18] sm:$0xf] %vm1482_vm7, %v1480_v62  ;;  %v1478_v9 = vpack.c.bf16 %v1470_v40, %v1470_v40 }
 0x13d   : > { %v1481_v19 = vpack.c.bf16 %v1473_v63, %v1473_v63  ;;  %v1471_v8 = vmax.f32 %v1463_v51, 0.0 }
 0x13e   : > { %1487 = vst.msk [vmem:[%s2475_s21 + $0x10] sm:$0xf] %vm1482_vm7, %v1478_v9 }
 0x13f   : > { %1490 = vst.msk [vmem:[%s2475_s21 + $0x1c] sm:$0xf] %vm1482_vm7, %v1481_v19  ;;  %v1479_v42 = vpack.c.bf16 %v1471_v8, %v1471_v8 }
 0x141   : > { %1488 = vst.msk [vmem:[%s2475_s21 + $0x14] sm:$0xf] %vm1482_vm7, %v1479_v42 }
 0x142 PF: > { %s14_s17 = sadd.s32 1, %s1993_s17   ;;  %s2525_s15 = smov %s1989_s16 }
 0x143   : > { %p11_p5 = scmp.ge.s32.totalorder %s14_s17, 4   ;;  %s2526_s16 = smov %s2528_s18 }
 0x145   :  { %13 = sbr.rel (!%p11_p5) target bundleno = 2 (0x2), region = 83 }

// kernel: bottleneck_forward.9
= control target key start
LH: loop header
LB: loop body
LE: loop exit
PB: predicated region body
PF: predicated region fallthrough
CT: control target
= control target key end

     0   :  { %11 = vsyncpa [#allocation3], 0  ;;  %s1105_s0 = inlined_call_operand.vmem [shape: bf16[2,64,64], index: 0, kind: input, shape index: {}]   ;;  %s1106_s1 = inlined_call_operand.vmem [shape: bf16[2,64,32], index: 1, kind: input, shape index: {}]   ;;  %s1107_s2 = inlined_call_operand.vmem [shape: bf16[32,64], index: 2, kind: input, shape index: {}]   ;;  %s1108_s3 = inlined_call_operand.vmem [shape: f32[1,64], index: 3, kind: input, shape index: {}]   ;;  %s1109_s4 = inlined_call_operand.vmem [shape: f32[1,64], index: 4, kind: input, shape index: {}]   ;;  %s1110_s5 = inlined_call_operand.vmem [shape: f32[2,1,64], index: 5, kind: input, shape index: {}]   ;;  %s1111_s6 = inlined_call_operand.hbm [shape: bf16[2,64,64], index: 6, kind: output, shape index: {}]  }
   0x1   :  { %13 = vsyncpa [#allocation3 + $0x1], 0  ;;  %s961_s21 = smov 0   ;;  %s963_s22 = smov 0  }
   0x2   :  { %s965_s23 = smov 0   ;;  %s967_s24 = smov 0  }
   0x3   :  { %s969_s25 = smov 0   ;;  %s971_s26 = smov 0  }
   0x4 LB: > { %s694_s27 = sadd.s32 4294967295, %s921_s26   ;;  %s695_s28 = sadd.s32 4294967294, %s921_s26   ;;  %s921_s26 = sphi %s971_s26, %s19_s26   ;;  %s917_s25 = sphi %s969_s25, %s1118_s25   ;;  %s913_s24 = sphi %s967_s24, %s1117_s24   ;;  %s909_s23 = sphi %s965_s23, %s1116_s23   ;;  %s905_s22 = sphi %s963_s22, %s1115_s22   ;;  %s901_s21 = sphi %s961_s21, %s1114_s21  }
   0x5   : > { %s31_s29 = sadd.s32 1, %s917_s25  ;;  %s185_s30 = sadd.s32 1, %s909_s23 }
   0x6   : > { %p33_p0 = scmp.ge.s32.totalorder %s31_s29, 2  ;;  %p195_p1 = scmp.ne.s32.totalorder %s909_s23, %s905_s22 }
   0x7   : > { %p196_p2 = scmp.eq.s32.totalorder %s694_s27, 1  ;;  %p201_p3 = scmp.ne.s32.totalorder %s905_s22, %s901_s21 }
   0x8   : > { %s1120_s29 = smov (%p33_p0, %s31_s29), 0  ;;  %p202_p5 = scmp.eq.s32.totalorder %s695_s28, 1 }
   0x9   : > { %p1001_p4 = por %p196_p2, %p195_p1  ;;  %s180_s8 = ssub.s32 %s917_s25, %s1120_s29 }
   0xa   : > { %p698_p6 = scmp.ge.s32.totalorder %s921_s26, 1  ;;  %p183_p7 = scmp.eq.s32.totalorder %s180_s8, 0 }
   0xb   : > { %p1008_p8 = por %p202_p5, %p201_p3  ;;  %p261_p9 = scmp.lt.s32.totalorder %s921_s26, 3 }
   0xc   : > { %s1014_s10 = scalar_select %p183_p7, %s909_s23, %s185_s30  }
   0xd   : > { %p262_p10 = pnand %p698_p6, %p261_p9 }
   0xe   : > { %p308_p11 = scmp.lt.s32.totalorder (!%p262_p10), %s913_s24, 1 }
   0xf   : > { %265 = sbr.rel (%p262_p10) target bundleno = 253 (0xfd), region = 44 }
  0x14   : > { %v839_v0 = vld [vmem:[%s1107_s2 + $0x8] sm:$0xff]   ;;  %v840_v1 = vld [vmem:[%s1107_s2] sm:$0xff]   ;;  %s309_s15 = scalar_select %p308_p11, %s913_s24, 1  ;;  %vm376_vm0 = vcmask 261120   ;;  %vm563_vm1 = vcmask 519168  }
  0x15   : > { %766 = vmatprep.subr.bf16.mxu0 %v839_v0  ;;  %778 = vmatprep.subr.bf16.mxu1 %v839_v0  ;;  %v714_v27 = vld [vmem:[%s1108_s3] ss:$0 sm:$0xff] }
  0x16   : > { %767 = vmatpush3.bf16.msra.mxu0 %v839_v0  ;;  %780 = vmatpush3.bf16.msra.mxu1 %v839_v0  ;;  %s730_s16 = sshll.u32 %s309_s15, 5  ;;  %s329_s11 = scalar_lea.vmem %s1110_s5, %s309_s15  ;;  %v715_v29 = vld [vmem:[%s1109_s4] ss:$0 sm:$0xff] }
  0x17   : > { %768 = vmatprep.subr.bf16.mxu0 %v840_v1  ;;  %779 = vmatprep.subr.bf16.mxu1 %v840_v1  ;;  %s325_s19 = scalar_lea.vmem %s1106_s1, %s730_s16  ;;  %s315_s28 = scalar_lea.vmem %s1105_s0, %s730_s16  ;;  %v716_v10 = vld [vmem:[%s329_s11] ss:$0 sm:$0xff] }
  0x18   : > { %v841_v2 = vld [vmem:[%s325_s19] sm:$0xff]   ;;  %v842_v3 = vld [vmem:[%s325_s19 + $0x10] sm:$0xff]   ;;  %v843_v4 = vld [vmem:[%s325_s19 + $0x8] sm:$0xff]   ;;  %s304_s16 = sand.u32 1, %s905_s22   ;;  %s923_s11 = smov [#allocation2]  }
  0x19   : > { %770 = vmatprep.mubr.msk.bf16.mxu0 %vm376_vm0, %v841_v2  ;;  %774 = vmatprep.mubr.msk.bf16.mxu1 %vm376_vm0, %v842_v3  ;;  %v844_v5 = vld [vmem:[%s325_s19 + $0x18] sm:$0xff]   ;;  %v757_v6 = vld [vmem:[%s315_s28 + $0x8] sm:$0xff]   ;;  %v742_v11 = vld [vmem:[%s315_s28] sm:$0xff]   ;;  %s699_s17 = sshll.u32 %s304_s16, 5  ;;  %s740_s19 = sshll.u32 %s913_s24, 9 }
  0x1a   : > { %769 = vmatpush3.bf16.msra.mxu0 %v840_v1  ;;  %781 = vmatpush3.bf16.msra.mxu1 %v840_v1  ;;  %v759_v7 = vld [vmem:[%s315_s28 + $0x18] sm:$0xff]   ;;  %v747_v8 = vunpack.c.l.bf16 %v757_v6  ;;  %v758_v12 = vld [vmem:[%s315_s28 + $0x10] sm:$0xff]   ;;  %v743_v15 = vunpack.c.l.bf16 %v742_v11  ;;  %v748_v19 = vunpack.c.h.bf16 %v757_v6  ;;  %v744_v23 = vunpack.c.h.bf16 %v742_v11  ;;  %s306_s18 = scalar_lea.vmem [#allocation2], %s699_s17  ;;  %s1051_s30 = scalar_lea.hbm %s1111_s6, %s740_s19 }
  0x1b   : > { %v755_v9 = vunpack.c.l.bf16 %v759_v7  ;;  %v751_v16 = vunpack.c.l.bf16 %v758_v12  ;;  %v756_v20 = vunpack.c.h.bf16 %v759_v7  ;;  %v752_v24 = vunpack.c.h.bf16 %v758_v12  ;;  %s588_s20 = sshll.u32 %s306_s18, 4  ;;  %s1060_s24 = scalar_lea.sflag [#allocation3], %s304_s16  ;;  %s1053_s20 = int_to_ptr.vmem [resolvable:$true] %s588_s20 }
  0x1c   : > { %v509_v13 = vmul.f32 %v747_v8, %v716_v10  ;;  %v507_v17 = vmul.f32 %v743_v15, %v716_v10  ;;  %v510_v21 = vmul.f32 %v748_v19, %v716_v10  ;;  %v508_v25 = vmul.f32 %v744_v23, %v716_v10  ;;  %s845_s8 = scalar_lea.vmem %s1053_s20, 512  ;;  %s849_s12 = sshll.u32 %s923_s11, 4  ;;  %s850_s12 = int_to_ptr.vmem [resolvable:$false] %s849_s12 }
  0x1d   : > { %771 = vmatmul.mubr.msk.bf16.vlgmr.msra.gmra.mxu0 %vm376_vm0, %v843_v4  ;;  %775 = vmatmul.mubr.msk.bf16.vlgmr.msra.gmra.mxu1 %vm376_vm0, %v844_v5  ;;  %v513_v14 = vmul.f32 %v755_v9, %v716_v10  ;;  %v511_v18 = vmul.f32 %v751_v16, %v716_v10  ;;  %v514_v22 = vmul.f32 %v756_v20, %v716_v10  ;;  %p846_p12 = scmp.ne.s32.totalorder %s1053_s20, %s845_s8  ;;  %s851_s13 = scalar_lea.vmem %s850_s12, 1024 }
  0x1e   : > { %v512_v26 = vmul.f32 %v752_v24, %v716_v10  ;;  %p852_p1 = scmp.lt.s32.totalorder %s1053_s20, %s850_s12  ;;  %p853_p2 = scmp.lt.s32.totalorder %s851_s13, %s845_s8 }
  0x1f   : > { %p847_p13 = pnand %p846_p12, %p1001_p4 }
  0x20   : > { %p854_p3 = por %p853_p2, %p852_p1 }
  0x21   : > { %p848_p0 = pneg %p847_p13 }
  0x23   : > { %p855_p5 = pnand %p854_p3, %p848_p0 }
  0xdd   : > { %v772_v28 = vpop.f32.mrf.mxu0  ;;  %v776_v31 = vpop.f32.mrf.mxu1 }
  0xde   : > { %v463_v30 = vmul.f32 %v772_v28, %v714_v27  ;;  %v467_v32 = vmul.f32 %v776_v31, %v714_v27 }
  0xdf   : > { %v423_v33 = vpop.f32.mrf.mxu0  ;;  %v439_v36 = vpop.f32.mrf.mxu1 }
  0xe0   : > { %v478_v34 = vadd.f32 %v715_v29, %v463_v30  ;;  %v461_v35 = vmul.f32 %v714_v27, %v423_v33  ;;  %v482_v37 = vadd.f32 %v715_v29, %v467_v32  ;;  %v465_v38 = vmul.f32 %v714_v27, %v439_v36 }
  0xe1   : > { %v773_v39 = vpop.f32.mrf.mxu0  ;;  %v777_v43 = vpop.f32.mrf.mxu1 }
  0xe2   : > { %v517_v40 = vadd.f32 %v509_v13, %v478_v34  ;;  %v476_v41 = vadd.f32 %v715_v29, %v461_v35  ;;  %v464_v42 = vmul.f32 %v773_v39, %v714_v27  ;;  %v521_v44 = vadd.f32 %v513_v14, %v482_v37 }
  0xe3   : > { %v480_v45 = vadd.f32 %v715_v29, %v465_v38  ;;  %v468_v46 = vmul.f32 %v777_v43, %v714_v27  ;;  %v426_v47 = vpop.f32.mrf.mxu0  ;;  %v442_v52 = vpop.f32.mrf.mxu1 }
  0xe4   : > { %v525_v48 = vmax.f32 %v517_v40, 0.0  ;;  %v515_v49 = vadd.f32 %v507_v17, %v476_v41  ;;  %v479_v50 = vadd.f32 %v715_v29, %v464_v42  ;;  %v462_v51 = vmul.f32 %v714_v27, %v426_v47 }
  0xe5   : > { %v529_v53 = vmax.f32 %v521_v44, 0.0  ;;  %v519_v54 = vadd.f32 %v511_v18, %v480_v45  ;;  %v483_v55 = vadd.f32 %v715_v29, %v468_v46  ;;  %v466_v56 = vmul.f32 %v714_v27, %v442_v52 }
  0xe6   : > { %v734_v57 = vpack.c.bf16 %v525_v48, %v525_v48  ;;  %v523_v58 = vmax.f32 %v515_v49, 0.0  ;;  %v518_v59 = vadd.f32 %v510_v21, %v479_v50  ;;  %v477_v60 = vadd.f32 %v715_v29, %v462_v51 }
  0xe7   : > { %v738_v61 = vpack.c.bf16 %v529_v53, %v529_v53  ;;  %v527_v62 = vmax.f32 %v519_v54, 0.0  ;;  %v522_v63 = vadd.f32 %v514_v22, %v483_v55  ;;  %v481_v0 = vadd.f32 %v715_v29, %v466_v56 }
  0xe8   : > { %566 = vst.msk [vmem:[%s306_s18 + $0x8] sm:$0xf] %vm563_vm1, %v734_v57  ;;  %v732_v1 = vpack.c.bf16 %v523_v58, %v523_v58  ;;  %v526_v2 = vmax.f32 %v518_v59, 0.0  ;;  %v516_v3 = vadd.f32 %v508_v25, %v477_v60 }
  0xe9   : > { %570 = vst.msk [vmem:[%s306_s18 + $0x18] sm:$0xf] %vm563_vm1, %v738_v61  ;;  %v736_v4 = vpack.c.bf16 %v527_v62, %v527_v62  ;;  %v530_v5 = vmax.f32 %v522_v63, 0.0  ;;  %v520_v6 = vadd.f32 %v512_v26, %v481_v0 }
  0xea   : > { %564 = vst.msk [vmem:[%s306_s18] sm:$0xf] %vm563_vm1, %v732_v1  ;;  %v735_v7 = vpack.c.bf16 %v526_v2, %v526_v2  ;;  %v524_v8 = vmax.f32 %v516_v3, 0.0 }
  0xeb   : > { %568 = vst.msk [vmem:[%s306_s18 + $0x10] sm:$0xf] %vm563_vm1, %v736_v4  ;;  %v739_v9 = vpack.c.bf16 %v530_v5, %v530_v5  ;;  %v528_v10 = vmax.f32 %v520_v6, 0.0 }
  0xec   : > { %567 = vst.msk [vmem:[%s306_s18 + $0xc] sm:$0xf] %vm563_vm1, %v735_v7  ;;  %v733_v11 = vpack.c.bf16 %v524_v8, %v524_v8 }
  0xed   : > { %571 = vst.msk [vmem:[%s306_s18 + $0x1c] sm:$0xf] %vm563_vm1, %v739_v9  ;;  %v737_v12 = vpack.c.bf16 %v528_v10, %v528_v10 }
  0xee   : > { %565 = vst.msk [vmem:[%s306_s18 + $0x4] sm:$0xf] %vm563_vm1, %v733_v11 }
  0xef   : > { %569 = vst.msk [vmem:[%s306_s18 + $0x14] sm:$0xf] %vm563_vm1, %v737_v12 }
  0xf0   : > { %858 = shalt.err (!%p855_p5)
}
  0xf1   : > { %s859_s14 = scalar_lea.hbm %s1051_s30, 512  ;;  %s863_s17 = scalar_lea.hbm %s1111_s6, 1024 }
  0xf2   : > { %p860_p6 = scmp.ne.s32.totalorder %s1051_s30, %s859_s14  ;;  %p864_p10 = scmp.lt.s32.totalorder %s1051_s30, %s1111_s6 }
  0xf3   : > { %p865_p11 = scmp.lt.s32.totalorder %s863_s17, %s859_s14 }
  0xf4   : > { %p861_p7 = pnand %p860_p6, %p1001_p4 }
  0xf5   : > { %p866_p12 = por %p865_p11, %p864_p10 }
  0xf6   : > { %p862_p9 = pneg %p861_p7 }
  0xf8   : > { %p867_p13 = pnand %p866_p12, %p862_p9 }
  0xfa   : > { %870 = shalt.err (!%p867_p13)
}
  0xfb   : > { %s924_s27 = smov 64   ;;  %s925_s28 = smov 4  }
  0xfc   : > { %782 = dma.vmem_to_hbm [thread:$0]  (%p1001_p4), %s1053_s20, 512, %s1051_s30, %s1060_s24, %s924_s27, %s924_s27, %s925_s28  }
  0xfd PF: > { %p788_p0 = scmp.ge.s32.totalorder %s921_s26, 2  ;;  %s603_s8 = sand.u32 1, %s901_s21  }
  0xfe   : > { %s604_s11 = scalar_lea.sflag [#allocation3], %s603_s8 }
  0xff   : > { %p785_p1 = pnand %p788_p0, %p1008_p8 }
 0x101   : > { %p786_p2 = pneg %p785_p1 }
 0x103   : > { %896 = dma.done.wait (%p786_p2), %s604_s11, 512  }
 0x104   : > { %898 = vsyncadd (%p786_p2), %s604_s11, 4294966784  ;;  %s19_s26 = sadd.s32 1, %s921_s26   ;;  %s1114_s21 = smov %s905_s22 }
 0x105   : > { %p16_p3 = scmp.ge.s32.totalorder %s19_s26, 4   ;;  %s1115_s22 = smov %s909_s23 }
 0x106   : > { %s1116_s23 = smov %s1014_s10  ;;  %s1117_s24 = smov %s917_s25 }
 0x107   : > { %s1118_s25 = smov %s1120_s29  ;;  %18 = sbr.rel (!%p16_p3) target bundleno = 4 (0x4), region = 85 }
 0x10c   :  { %609 = vsyncpa [#allocation3], 1 }
 0x10d   :  { %611 = vsyncpa [#allocation3 + $0x1], 1 }

</bundles_post_ra>
